<compile_context>
chip_gen: v5e
topology: v5e:2x2
jax: 0.10.0
libtpu: 0.0.40
codegen_flags: <defaults>
</compile_context>

<pallas_src>
import math

import jax
import jax.numpy as jnp
import numpy as np
from jax.experimental import pallas as pl
from jax.experimental.pallas import tpu as pltpu

# ---------------- model dims (small, consistent with the module) --------------
B = 2            # batch
T = 8            # sequence length
C = 32           # embed_size
H = 4            # head_count
D = C // H       # head_dim
EPS = 1e-5       # nn.LayerNorm default eps

C_AUG = 40       # C + 1 (ones column for bias folding) padded to a multiple of 8
WO_R0 = C_AUG    # first row of the [Wo | W1 | W2] block inside the param slab
VEC_R0 = WO_R0 + C                      # first const-vector row
ROW_BO, ROW_G1, ROW_BE1, ROW_B1, ROW_B2, ROW_G2, ROW_BE2 = range(VEC_R0, VEC_R0 + 7)
P_ROWS = VEC_R0 + 8                     # 80 rows total (sublane-aligned)
P_COLS = 3 * C                          # 96 lanes


def _layer_norm(x, gamma, beta):
    mu = jnp.mean(x, axis=-1, keepdims=True)
    var = jnp.mean((x - mu) ** 2, axis=-1, keepdims=True)
    return (x - mu) * jax.lax.rsqrt(var + EPS) * gamma + beta


def transformer_block_kernel(x_ref, p_ref, o_ref):
    # x_ref: (T, C_AUG)  -- cols [0:C]=x, col C = 1.0, cols [C+1:C_AUG]=0
    # p_ref: (P_ROWS, P_COLS) packed parameter slab (see pack_params)
    x_aug = x_ref[...]
    x = x_aug[:, :C]                                            # residual stream

    def vec(row):                                               # (1, C) const row
        return p_ref[row:row + 1, 0:C]

    # ---- fused QKV projection + bias (ones column), Q pre-scaled by 1/sqrt(D) ----
    qkv = jnp.dot(x_aug, p_ref[0:C_AUG, :],
                  preferred_element_type=jnp.float32)           # (T, 3C) head-grouped

    # ---- per-head attention, accumulated straight through Wo (no VMEM scratch) ----
    acc = jnp.zeros((T, C), jnp.float32)
    for h in range(H):
        base = 3 * D * h
        qh = qkv[:, base:base + D]                              # (T, D)
        kh = qkv[:, base + D:base + 2 * D]                      # (T, D)
        vh = qkv[:, base + 2 * D:base + 3 * D]                  # (T, D)

        s = jax.lax.dot_general(qh, kh, (((1,), (1,)), ((), ())),
                                preferred_element_type=jnp.float32)   # (T, T)
        s = s - jnp.max(s, axis=-1, keepdims=True)
        e = jnp.exp(s)
        attn = e / jnp.sum(e, axis=-1, keepdims=True)           # exact softmax
        # TODO(synk): dropout on attention probabilities omitted (eval-mode identity).

        hv = jnp.dot(attn, vh, preferred_element_type=jnp.float32)    # (T, D)
        wo_h = p_ref[WO_R0 + h * D:WO_R0 + (h + 1) * D, 0:C]          # (D, C)
        acc = acc + jnp.dot(hv, wo_h, preferred_element_type=jnp.float32)

    attn_out = acc + vec(ROW_BO)

    # ---- residual + LayerNorm 1 ----
    y = _layer_norm(attn_out + x, vec(ROW_G1), vec(ROW_BE1))

    # ---- feed-forward: Linear -> ReLU -> Linear ----
    w1 = p_ref[WO_R0:WO_R0 + C, C:2 * C]
    w2 = p_ref[WO_R0:WO_R0 + C, 2 * C:3 * C]
    h1 = jnp.dot(y, w1, preferred_element_type=jnp.float32) + vec(ROW_B1)
    h1 = jnp.maximum(h1, 0.0)
    h2 = jnp.dot(h1, w2, preferred_element_type=jnp.float32) + vec(ROW_B2)

    # ---- residual + LayerNorm 2 ----
    out = _layer_norm(h2 + y, vec(ROW_G2), vec(ROW_BE2))
    o_ref[...] = out.astype(o_ref.dtype)


@jax.jit
def transformer_block(x, pslab):
    """x: (B, T, C) float32.  pslab: packed (P_ROWS, P_COLS) parameter slab."""
    Bx, Tx, Cx = x.shape
    x2 = x.reshape(Bx * Tx, Cx)
    ones = jnp.ones((Bx * Tx, 1), x2.dtype)
    pad = jnp.zeros((Bx * Tx, C_AUG - Cx - 1), x2.dtype)
    x_aug = jnp.concatenate([x2, ones, pad], axis=1)            # (B*T, C_AUG)

    out2 = pl.pallas_call(
        transformer_block_kernel,
        out_shape=jax.ShapeDtypeStruct((Bx * Tx, Cx), jnp.float32),
        grid=(Bx,),
        in_specs=[
            pl.BlockSpec((Tx, C_AUG), lambda b: (b, 0)),        # one batch per step
            pl.BlockSpec((P_ROWS, P_COLS), lambda b: (0, 0)),   # weights resident
        ],
        out_specs=pl.BlockSpec((Tx, Cx), lambda b: (b, 0)),
        compiler_params=pltpu.CompilerParams(
            dimension_semantics=("parallel",)),                 # v7x: one batch per TC
    )(x_aug, pslab)
    return out2.reshape(Bx, Tx, Cx)


def pack_params(p):
    """Pack PyTorch-style params (weights stored [in, out]) into one f32 slab.

    Layout (P_ROWS=80, P_COLS=96):
      rows 0:32   cols 0:96  fused QKV weight, columns head-grouped [q_h|k_h|v_h],
                             Q columns pre-scaled by 1/sqrt(D)
      row  32     cols 0:96  fused QKV bias row (picked up by the ones column of x_aug)
      rows 33:40             zero padding (matches zero columns of x_aug)
      rows 40:72  cols 0:32  Wo   | cols 32:64 W1 | cols 64:96 W2
      rows 72:79  cols 0:32  const vectors: bo, g1, be1, b1, b2, g2, be2
    """
    scale = 1.0 / math.sqrt(D)
    wq, bq = p["wq"] * scale, p["bq"] * scale

    w_cols, b_cols = [], []
    for h in range(H):
        hs = slice(h * D, (h + 1) * D)
        w_cols += [wq[:, hs], p["wk"][:, hs], p["wv"][:, hs]]
        b_cols += [bq[hs], p["bk"][hs], p["bv"][hs]]
    wqkv = jnp.concatenate(w_cols, axis=1)                      # (C, 3C) head-grouped
    bqkv = jnp.concatenate(b_cols)                              # (3C,)

    wqkv_aug = (jnp.zeros((C_AUG, 3 * C), jnp.float32)
                .at[:C].set(wqkv)
                .at[C].set(bqkv))                               # (C_AUG, 3C)

    mats = jnp.concatenate([p["wo"], p["w1"], p["w2"]], axis=1)  # (C, 3C)

    vec_rows = jnp.stack([p["bo"], p["g1"], p["be1"], p["b1"],
                          p["b2"], p["g2"], p["be2"]])           # (7, C)
    vec_tab = jnp.zeros((8, 3 * C), jnp.float32).at[:7, :C].set(vec_rows)

    return jnp.concatenate([wqkv_aug, mats, vec_tab], axis=0)    # (P_ROWS, P_COLS)


def reference_block(x, p):
    """Pure-JAX reference of the same forward pass (for validation)."""
    def ln(v, g, b):
        mu = jnp.mean(v, axis=-1, keepdims=True)
        var = jnp.mean((v - mu) ** 2, axis=-1, keepdims=True)
        return (v - mu) / jnp.sqrt(var + EPS) * g + b

    Bx, Tx, Cx = x.shape
    q = x @ p["wq"] + p["bq"]
    k = x @ p["wk"] + p["bk"]
    v = x @ p["wv"] + p["bv"]
    qh = q.reshape(Bx, Tx, H, D).transpose(0, 2, 1, 3)
    kh = k.reshape(Bx, Tx, H, D).transpose(0, 2, 1, 3)
    vh = v.reshape(Bx, Tx, H, D).transpose(0, 2, 1, 3)
    scores = jnp.einsum("bhqd,bhkd->bhqk", qh, kh) / math.sqrt(D)
    attn = jax.nn.softmax(scores, axis=-1)
    ao = jnp.einsum("bhqk,bhkd->bhqd", attn, vh).transpose(0, 2, 1, 3).reshape(Bx, Tx, Cx)
    ao = ao @ p["wo"] + p["bo"]
    y = ln(ao + x, p["g1"], p["be1"])
    h1 = jnp.maximum(y @ p["w1"] + p["b1"], 0.0)
    h2 = h1 @ p["w2"] + p["b2"]
    return ln(h2 + y, p["g2"], p["be2"])


def init_params(key):
    """Deterministic nn.Linear-style init. Weights stored as [in, out]."""
    keys = jax.random.split(key, 12)
    bound = 1.0 / math.sqrt(C)

    def lin(kw, kb):
        w = jax.random.uniform(kw, (C, C), jnp.float32, -bound, bound)
        b = jax.random.uniform(kb, (C,), jnp.float32, -bound, bound)
        return w, b

    wq, bq = lin(keys[0], keys[1])
    wk, bk = lin(keys[2], keys[3])
    wv, bv = lin(keys[4], keys[5])
    wo, bo = lin(keys[6], keys[7])
    w1, b1 = lin(keys[8], keys[9])
    w2, b2 = lin(keys[10], keys[11])
    return {
        "wq": wq, "bq": bq, "wk": wk, "bk": bk, "wv": wv, "bv": bv,
        "wo": wo, "bo": bo,
        "g1": jnp.ones((C,), jnp.float32), "be1": jnp.zeros((C,), jnp.float32),
        "w1": w1, "b1": b1, "w2": w2, "b2": b2,
        "g2": jnp.ones((C,), jnp.float32), "be2": jnp.zeros((C,), jnp.float32),
    }


if __name__ == "__main__":
    # Force exact-f32 matmuls in the XLA reference so kernel vs reference only
    # differ by accumulation order (lets us keep a tight tolerance).
    jax.config.update("jax_default_matmul_precision", "highest")

    root = jax.random.PRNGKey(0)
    k_x, k_p = jax.random.split(root)
    x = jax.random.normal(k_x, (B, T, C), jnp.float32)

    raw_params = init_params(k_p)
    kernel_params = pack_params(raw_params)   # one-time parameter packing/fusion

    out = jax.block_until_ready(transformer_block(x, kernel_params))
    ref = jax.block_until_ready(reference_block(x, raw_params))

    # Exact softmax reciprocal restored -> tolerance back near f32 rounding noise.
    np.testing.assert_allclose(np.asarray(out), np.asarray(ref), atol=1e-4, rtol=1e-4)

    print("KERNEL_OK")
</pallas_src>

<mosaic_0001>
module attributes {stable_mosaic.version = 11 : i64} {
  func.func @transformer_block_kernel(%arg0: i32, %arg1: memref<8x40xf32, #tpu.memory_space<vmem>>, %arg2: memref<80x96xf32, #tpu.memory_space<vmem>>, %arg3: memref<8x32xf32, #tpu.memory_space<vmem>>) attributes {dimension_semantics = [#tpu.dimension_semantics<parallel>], iteration_bounds = array<i64: 2>, scalar_prefetch = 0 : i64, scratch_operands = 0 : i64, tpu.core_type = #tpu.core_type<tc>, window_params = [{transform_indices = @transform_0, window_bounds = array<i64: 8, 40>}, {pipeline_mode = #tpu.pipeline_mode<synchronous>, transform_indices = @transform_1, window_bounds = array<i64: 80, 96>}, {transform_indices = @transform_2, window_bounds = array<i64: 8, 32>}]} {
    %c0 = arith.constant 0 : index
    %c0_0 = arith.constant 0 : index
    %0 = vector.load %arg1[%c0, %c0_0] : memref<8x40xf32, #tpu.memory_space<vmem>>, vector<8x40xf32>
    %1 = vector.extract_strided_slice %0 {offsets = [0, 0], sizes = [8, 32], strides = [1, 1]} : vector<8x40xf32> to vector<8x32xf32>
    %c0_1 = arith.constant 0 : index
    %c0_2 = arith.constant 0 : index
    %2 = vector.load %arg2[%c0_1, %c0_2] : memref<80x96xf32, #tpu.memory_space<vmem>>, vector<40x96xf32>
    %cst = arith.constant dense<0.000000e+00> : vector<8x96xf32>
    %3 = tpu.matmul %0, %2, %cst {dimension_numbers = #tpu.dot_dimension_numbers<[1], [0], [0], [1], [0, 0, 1, 1], [], []>, precision = #tpu.contract_precision<fp32>} : vector<8x40xf32>, vector<40x96xf32>, vector<8x96xf32> -> vector<8x96xf32>
    %cst_3 = arith.constant 0.000000e+00 : f32
    %4 = vector.broadcast %cst_3 : f32 to vector<8x32xf32>
    %5 = vector.extract_strided_slice %3 {offsets = [0, 0], sizes = [8, 8], strides = [1, 1]} : vector<8x96xf32> to vector<8x8xf32>
    %6 = vector.extract_strided_slice %3 {offsets = [0, 8], sizes = [8, 8], strides = [1, 1]} : vector<8x96xf32> to vector<8x8xf32>
    %7 = vector.extract_strided_slice %3 {offsets = [0, 16], sizes = [8, 8], strides = [1, 1]} : vector<8x96xf32> to vector<8x8xf32>
    %cst_4 = arith.constant dense<0.000000e+00> : vector<8x8xf32>
    %8 = tpu.matmul %5, %6, %cst_4 {dimension_numbers = #tpu.dot_dimension_numbers<[1], [1], [0], [0], [0, 0, 1, 0], [], []>, precision = #tpu.contract_precision<fp32>} : vector<8x8xf32>, vector<8x8xf32>, vector<8x8xf32> -> vector<8x8xf32>
    %cst_5 = arith.constant dense<0xFF800000> : vector<8xf32>
    %9 = vector.multi_reduction <maximumf>, %8, %cst_5 [1] : vector<8x8xf32> to vector<8xf32>
    %10 = vector.shape_cast %9 : vector<8xf32> to vector<8x1xf32>
    %11 = vector.broadcast %10 : vector<8x1xf32> to vector<8x8xf32>
    %12 = arith.subf %8, %11 : vector<8x8xf32>
    %13 = math.exp %12 : vector<8x8xf32>
    %cst_6 = arith.constant dense<0.000000e+00> : vector<8xf32>
    %14 = vector.multi_reduction <add>, %13, %cst_6 [1] : vector<8x8xf32> to vector<8xf32>
    %15 = vector.shape_cast %14 : vector<8xf32> to vector<8x1xf32>
    %16 = vector.broadcast %15 : vector<8x1xf32> to vector<8x8xf32>
    %17 = arith.divf %13, %16 : vector<8x8xf32>
    %cst_7 = arith.constant dense<0.000000e+00> : vector<8x8xf32>
    %18 = tpu.matmul %17, %7, %cst_7 {dimension_numbers = #tpu.dot_dimension_numbers<[1], [0], [0], [1], [0, 0, 1, 1], [], []>, precision = #tpu.contract_precision<fp32>} : vector<8x8xf32>, vector<8x8xf32>, vector<8x8xf32> -> vector<8x8xf32>
    %c40 = arith.constant 40 : index
    %c0_8 = arith.constant 0 : index
    %19 = vector.load %arg2[%c40, %c0_8] : memref<80x96xf32, #tpu.memory_space<vmem>>, vector<8x32xf32>
    %cst_9 = arith.constant dense<0.000000e+00> : vector<8x32xf32>
    %20 = tpu.matmul %18, %19, %cst_9 {dimension_numbers = #tpu.dot_dimension_numbers<[1], [0], [0], [1], [0, 0, 1, 1], [], []>, precision = #tpu.contract_precision<fp32>} : vector<8x8xf32>, vector<8x32xf32>, vector<8x32xf32> -> vector<8x32xf32>
    %21 = arith.addf %4, %20 : vector<8x32xf32>
    %22 = vector.extract_strided_slice %3 {offsets = [0, 24], sizes = [8, 8], strides = [1, 1]} : vector<8x96xf32> to vector<8x8xf32>
    %23 = vector.extract_strided_slice %3 {offsets = [0, 32], sizes = [8, 8], strides = [1, 1]} : vector<8x96xf32> to vector<8x8xf32>
    %24 = vector.extract_strided_slice %3 {offsets = [0, 40], sizes = [8, 8], strides = [1, 1]} : vector<8x96xf32> to vector<8x8xf32>
    %cst_10 = arith.constant dense<0.000000e+00> : vector<8x8xf32>
    %25 = tpu.matmul %22, %23, %cst_10 {dimension_numbers = #tpu.dot_dimension_numbers<[1], [1], [0], [0], [0, 0, 1, 0], [], []>, precision = #tpu.contract_precision<fp32>} : vector<8x8xf32>, vector<8x8xf32>, vector<8x8xf32> -> vector<8x8xf32>
    %cst_11 = arith.constant dense<0xFF800000> : vector<8xf32>
    %26 = vector.multi_reduction <maximumf>, %25, %cst_11 [1] : vector<8x8xf32> to vector<8xf32>
    %27 = vector.shape_cast %26 : vector<8xf32> to vector<8x1xf32>
    %28 = vector.broadcast %27 : vector<8x1xf32> to vector<8x8xf32>
    %29 = arith.subf %25, %28 : vector<8x8xf32>
    %30 = math.exp %29 : vector<8x8xf32>
    %cst_12 = arith.constant dense<0.000000e+00> : vector<8xf32>
    %31 = vector.multi_reduction <add>, %30, %cst_12 [1] : vector<8x8xf32> to vector<8xf32>
    %32 = vector.shape_cast %31 : vector<8xf32> to vector<8x1xf32>
    %33 = vector.broadcast %32 : vector<8x1xf32> to vector<8x8xf32>
    %34 = arith.divf %30, %33 : vector<8x8xf32>
    %cst_13 = arith.constant dense<0.000000e+00> : vector<8x8xf32>
    %35 = tpu.matmul %34, %24, %cst_13 {dimension_numbers = #tpu.dot_dimension_numbers<[1], [0], [0], [1], [0, 0, 1, 1], [], []>, precision = #tpu.contract_precision<fp32>} : vector<8x8xf32>, vector<8x8xf32>, vector<8x8xf32> -> vector<8x8xf32>
    %c48 = arith.constant 48 : index
    %c0_14 = arith.constant 0 : index
    %36 = vector.load %arg2[%c48, %c0_14] : memref<80x96xf32, #tpu.memory_space<vmem>>, vector<8x32xf32>
    %cst_15 = arith.constant dense<0.000000e+00> : vector<8x32xf32>
    %37 = tpu.matmul %35, %36, %cst_15 {dimension_numbers = #tpu.dot_dimension_numbers<[1], [0], [0], [1], [0, 0, 1, 1], [], []>, precision = #tpu.contract_precision<fp32>} : vector<8x8xf32>, vector<8x32xf32>, vector<8x32xf32> -> vector<8x32xf32>
    %38 = arith.addf %21, %37 : vector<8x32xf32>
    %39 = vector.extract_strided_slice %3 {offsets = [0, 48], sizes = [8, 8], strides = [1, 1]} : vector<8x96xf32> to vector<8x8xf32>
    %40 = vector.extract_strided_slice %3 {offsets = [0, 56], sizes = [8, 8], strides = [1, 1]} : vector<8x96xf32> to vector<8x8xf32>
    %41 = vector.extract_strided_slice %3 {offsets = [0, 64], sizes = [8, 8], strides = [1, 1]} : vector<8x96xf32> to vector<8x8xf32>
    %cst_16 = arith.constant dense<0.000000e+00> : vector<8x8xf32>
    %42 = tpu.matmul %39, %40, %cst_16 {dimension_numbers = #tpu.dot_dimension_numbers<[1], [1], [0], [0], [0, 0, 1, 0], [], []>, precision = #tpu.contract_precision<fp32>} : vector<8x8xf32>, vector<8x8xf32>, vector<8x8xf32> -> vector<8x8xf32>
    %cst_17 = arith.constant dense<0xFF800000> : vector<8xf32>
    %43 = vector.multi_reduction <maximumf>, %42, %cst_17 [1] : vector<8x8xf32> to vector<8xf32>
    %44 = vector.shape_cast %43 : vector<8xf32> to vector<8x1xf32>
    %45 = vector.broadcast %44 : vector<8x1xf32> to vector<8x8xf32>
    %46 = arith.subf %42, %45 : vector<8x8xf32>
    %47 = math.exp %46 : vector<8x8xf32>
    %cst_18 = arith.constant dense<0.000000e+00> : vector<8xf32>
    %48 = vector.multi_reduction <add>, %47, %cst_18 [1] : vector<8x8xf32> to vector<8xf32>
    %49 = vector.shape_cast %48 : vector<8xf32> to vector<8x1xf32>
    %50 = vector.broadcast %49 : vector<8x1xf32> to vector<8x8xf32>
    %51 = arith.divf %47, %50 : vector<8x8xf32>
    %cst_19 = arith.constant dense<0.000000e+00> : vector<8x8xf32>
    %52 = tpu.matmul %51, %41, %cst_19 {dimension_numbers = #tpu.dot_dimension_numbers<[1], [0], [0], [1], [0, 0, 1, 1], [], []>, precision = #tpu.contract_precision<fp32>} : vector<8x8xf32>, vector<8x8xf32>, vector<8x8xf32> -> vector<8x8xf32>
    %c56 = arith.constant 56 : index
    %c0_20 = arith.constant 0 : index
    %53 = vector.load %arg2[%c56, %c0_20] : memref<80x96xf32, #tpu.memory_space<vmem>>, vector<8x32xf32>
    %cst_21 = arith.constant dense<0.000000e+00> : vector<8x32xf32>
    %54 = tpu.matmul %52, %53, %cst_21 {dimension_numbers = #tpu.dot_dimension_numbers<[1], [0], [0], [1], [0, 0, 1, 1], [], []>, precision = #tpu.contract_precision<fp32>} : vector<8x8xf32>, vector<8x32xf32>, vector<8x32xf32> -> vector<8x32xf32>
    %55 = arith.addf %38, %54 : vector<8x32xf32>
    %56 = vector.extract_strided_slice %3 {offsets = [0, 72], sizes = [8, 8], strides = [1, 1]} : vector<8x96xf32> to vector<8x8xf32>
    %57 = vector.extract_strided_slice %3 {offsets = [0, 80], sizes = [8, 8], strides = [1, 1]} : vector<8x96xf32> to vector<8x8xf32>
    %58 = vector.extract_strided_slice %3 {offsets = [0, 88], sizes = [8, 8], strides = [1, 1]} : vector<8x96xf32> to vector<8x8xf32>
    %cst_22 = arith.constant dense<0.000000e+00> : vector<8x8xf32>
    %59 = tpu.matmul %56, %57, %cst_22 {dimension_numbers = #tpu.dot_dimension_numbers<[1], [1], [0], [0], [0, 0, 1, 0], [], []>, precision = #tpu.contract_precision<fp32>} : vector<8x8xf32>, vector<8x8xf32>, vector<8x8xf32> -> vector<8x8xf32>
    %cst_23 = arith.constant dense<0xFF800000> : vector<8xf32>
    %60 = vector.multi_reduction <maximumf>, %59, %cst_23 [1] : vector<8x8xf32> to vector<8xf32>
    %61 = vector.shape_cast %60 : vector<8xf32> to vector<8x1xf32>
    %62 = vector.broadcast %61 : vector<8x1xf32> to vector<8x8xf32>
    %63 = arith.subf %59, %62 : vector<8x8xf32>
    %64 = math.exp %63 : vector<8x8xf32>
    %cst_24 = arith.constant dense<0.000000e+00> : vector<8xf32>
    %65 = vector.multi_reduction <add>, %64, %cst_24 [1] : vector<8x8xf32> to vector<8xf32>
    %66 = vector.shape_cast %65 : vector<8xf32> to vector<8x1xf32>
    %67 = vector.broadcast %66 : vector<8x1xf32> to vector<8x8xf32>
    %68 = arith.divf %64, %67 : vector<8x8xf32>
    %cst_25 = arith.constant dense<0.000000e+00> : vector<8x8xf32>
    %69 = tpu.matmul %68, %58, %cst_25 {dimension_numbers = #tpu.dot_dimension_numbers<[1], [0], [0], [1], [0, 0, 1, 1], [], []>, precision = #tpu.contract_precision<fp32>} : vector<8x8xf32>, vector<8x8xf32>, vector<8x8xf32> -> vector<8x8xf32>
    %c64 = arith.constant 64 : index
    %c0_26 = arith.constant 0 : index
    %70 = vector.load %arg2[%c64, %c0_26] : memref<80x96xf32, #tpu.memory_space<vmem>>, vector<8x32xf32>
    %cst_27 = arith.constant dense<0.000000e+00> : vector<8x32xf32>
    %71 = tpu.matmul %69, %70, %cst_27 {dimension_numbers = #tpu.dot_dimension_numbers<[1], [0], [0], [1], [0, 0, 1, 1], [], []>, precision = #tpu.contract_precision<fp32>} : vector<8x8xf32>, vector<8x32xf32>, vector<8x32xf32> -> vector<8x32xf32>
    %72 = arith.addf %55, %71 : vector<8x32xf32>
    %c72 = arith.constant 72 : index
    %c0_28 = arith.constant 0 : index
    %73 = vector.load %arg2[%c72, %c0_28] : memref<80x96xf32, #tpu.memory_space<vmem>>, vector<1x32xf32>
    %74 = vector.broadcast %73 : vector<1x32xf32> to vector<8x32xf32>
    %75 = arith.addf %72, %74 : vector<8x32xf32>
    %76 = arith.addf %75, %1 : vector<8x32xf32>
    %c73 = arith.constant 73 : index
    %c0_29 = arith.constant 0 : index
    %77 = vector.load %arg2[%c73, %c0_29] : memref<80x96xf32, #tpu.memory_space<vmem>>, vector<1x32xf32>
    %c74 = arith.constant 74 : index
    %c0_30 = arith.constant 0 : index
    %78 = vector.load %arg2[%c74, %c0_30] : memref<80x96xf32, #tpu.memory_space<vmem>>, vector<1x32xf32>
    %cst_31 = arith.constant dense<0.000000e+00> : vector<8xf32>
    %79 = vector.multi_reduction <add>, %76, %cst_31 [1] : vector<8x32xf32> to vector<8xf32>
    %80 = vector.shape_cast %79 : vector<8xf32> to vector<8x1xf32>
    %cst_32 = arith.constant 3.200000e+01 : f32
    %81 = vector.broadcast %cst_32 : f32 to vector<8x1xf32>
    %82 = arith.divf %80, %81 : vector<8x1xf32>
    %83 = vector.broadcast %82 : vector<8x1xf32> to vector<8x32xf32>
    %84 = arith.subf %76, %83 : vector<8x32xf32>
    %85 = arith.mulf %84, %84 : vector<8x32xf32>
    %cst_33 = arith.constant dense<0.000000e+00> : vector<8xf32>
    %86 = vector.multi_reduction <add>, %85, %cst_33 [1] : vector<8x32xf32> to vector<8xf32>
    %87 = vector.shape_cast %86 : vector<8xf32> to vector<8x1xf32>
    %cst_34 = arith.constant 3.200000e+01 : f32
    %88 = vector.broadcast %cst_34 : f32 to vector<8x1xf32>
    %89 = arith.divf %87, %88 : vector<8x1xf32>
    %90 = vector.broadcast %82 : vector<8x1xf32> to vector<8x32xf32>
    %91 = arith.subf %76, %90 : vector<8x32xf32>
    %cst_35 = arith.constant 9.99999974E-6 : f32
    %92 = vector.broadcast %cst_35 : f32 to vector<8x1xf32>
    %93 = arith.addf %89, %92 : vector<8x1xf32>
    %94 = math.rsqrt %93 : vector<8x1xf32>
    %95 = vector.broadcast %94 : vector<8x1xf32> to vector<8x32xf32>
    %96 = arith.mulf %91, %95 : vector<8x32xf32>
    %97 = vector.broadcast %77 : vector<1x32xf32> to vector<8x32xf32>
    %98 = arith.mulf %96, %97 : vector<8x32xf32>
    %99 = vector.broadcast %78 : vector<1x32xf32> to vector<8x32xf32>
    %100 = arith.addf %98, %99 : vector<8x32xf32>
    %c40_36 = arith.constant 40 : index
    %c32 = arith.constant 32 : index
    %101 = vector.load %arg2[%c40_36, %c32] : memref<80x96xf32, #tpu.memory_space<vmem>>, vector<32x32xf32>
    %c40_37 = arith.constant 40 : index
    %c64_38 = arith.constant 64 : index
    %102 = vector.load %arg2[%c40_37, %c64_38] : memref<80x96xf32, #tpu.memory_space<vmem>>, vector<32x32xf32>
    %cst_39 = arith.constant dense<0.000000e+00> : vector<8x32xf32>
    %103 = tpu.matmul %100, %101, %cst_39 {dimension_numbers = #tpu.dot_dimension_numbers<[1], [0], [0], [1], [0, 0, 1, 1], [], []>, precision = #tpu.contract_precision<fp32>} : vector<8x32xf32>, vector<32x32xf32>, vector<8x32xf32> -> vector<8x32xf32>
    %c75 = arith.constant 75 : index
    %c0_40 = arith.constant 0 : index
    %104 = vector.load %arg2[%c75, %c0_40] : memref<80x96xf32, #tpu.memory_space<vmem>>, vector<1x32xf32>
    %105 = vector.broadcast %104 : vector<1x32xf32> to vector<8x32xf32>
    %106 = arith.addf %103, %105 : vector<8x32xf32>
    %cst_41 = arith.constant 0.000000e+00 : f32
    %107 = vector.broadcast %cst_41 : f32 to vector<8x32xf32>
    %108 = arith.maximumf %106, %107 : vector<8x32xf32>
    %cst_42 = arith.constant dense<0.000000e+00> : vector<8x32xf32>
    %109 = tpu.matmul %108, %102, %cst_42 {dimension_numbers = #tpu.dot_dimension_numbers<[1], [0], [0], [1], [0, 0, 1, 1], [], []>, precision = #tpu.contract_precision<fp32>} : vector<8x32xf32>, vector<32x32xf32>, vector<8x32xf32> -> vector<8x32xf32>
    %c76 = arith.constant 76 : index
    %c0_43 = arith.constant 0 : index
    %110 = vector.load %arg2[%c76, %c0_43] : memref<80x96xf32, #tpu.memory_space<vmem>>, vector<1x32xf32>
    %111 = vector.broadcast %110 : vector<1x32xf32> to vector<8x32xf32>
    %112 = arith.addf %109, %111 : vector<8x32xf32>
    %113 = arith.addf %112, %100 : vector<8x32xf32>
    %c77 = arith.constant 77 : index
    %c0_44 = arith.constant 0 : index
    %114 = vector.load %arg2[%c77, %c0_44] : memref<80x96xf32, #tpu.memory_space<vmem>>, vector<1x32xf32>
    %c78 = arith.constant 78 : index
    %c0_45 = arith.constant 0 : index
    %115 = vector.load %arg2[%c78, %c0_45] : memref<80x96xf32, #tpu.memory_space<vmem>>, vector<1x32xf32>
    %cst_46 = arith.constant dense<0.000000e+00> : vector<8xf32>
    %116 = vector.multi_reduction <add>, %113, %cst_46 [1] : vector<8x32xf32> to vector<8xf32>
    %117 = vector.shape_cast %116 : vector<8xf32> to vector<8x1xf32>
    %cst_47 = arith.constant 3.200000e+01 : f32
    %118 = vector.broadcast %cst_47 : f32 to vector<8x1xf32>
    %119 = arith.divf %117, %118 : vector<8x1xf32>
    %120 = vector.broadcast %119 : vector<8x1xf32> to vector<8x32xf32>
    %121 = arith.subf %113, %120 : vector<8x32xf32>
    %122 = arith.mulf %121, %121 : vector<8x32xf32>
    %cst_48 = arith.constant dense<0.000000e+00> : vector<8xf32>
    %123 = vector.multi_reduction <add>, %122, %cst_48 [1] : vector<8x32xf32> to vector<8xf32>
    %124 = vector.shape_cast %123 : vector<8xf32> to vector<8x1xf32>
    %cst_49 = arith.constant 3.200000e+01 : f32
    %125 = vector.broadcast %cst_49 : f32 to vector<8x1xf32>
    %126 = arith.divf %124, %125 : vector<8x1xf32>
    %127 = vector.broadcast %119 : vector<8x1xf32> to vector<8x32xf32>
    %128 = arith.subf %113, %127 : vector<8x32xf32>
    %cst_50 = arith.constant 9.99999974E-6 : f32
    %129 = vector.broadcast %cst_50 : f32 to vector<8x1xf32>
    %130 = arith.addf %126, %129 : vector<8x1xf32>
    %131 = math.rsqrt %130 : vector<8x1xf32>
    %132 = vector.broadcast %131 : vector<8x1xf32> to vector<8x32xf32>
    %133 = arith.mulf %128, %132 : vector<8x32xf32>
    %134 = vector.broadcast %114 : vector<1x32xf32> to vector<8x32xf32>
    %135 = arith.mulf %133, %134 : vector<8x32xf32>
    %136 = vector.broadcast %115 : vector<1x32xf32> to vector<8x32xf32>
    %137 = arith.addf %135, %136 : vector<8x32xf32>
    %c0_51 = arith.constant 0 : index
    %c0_52 = arith.constant 0 : index
    %138 = vector.load %arg3[%c0_51, %c0_52] : memref<8x32xf32, #tpu.memory_space<vmem>>, vector<8x32xf32>
    tpu.vector_store %arg3[%c0_51, %c0_52], %137 {strides = array<i32>} : memref<8x32xf32, #tpu.memory_space<vmem>>, vector<8x32xf32>,
    return
  }
  func.func @transform_0(%arg0: i32) -> (i32, i32) {
    %c0_i32 = arith.constant 0 : i32
    %c0_i32_0 = arith.constant 0 : i32
    return %arg0, %c0_i32 : i32, i32
  }
  func.func @transform_1(%arg0: i32) -> (i32, i32) {
    %c0_i32 = arith.constant 0 : i32
    %c0_i32_0 = arith.constant 0 : i32
    %c0_i32_1 = arith.constant 0 : i32
    return %c0_i32, %c0_i32_0 : i32, i32
  }
  func.func @transform_2(%arg0: i32) -> (i32, i32) {
    %c0_i32 = arith.constant 0 : i32
    %c0_i32_0 = arith.constant 0 : i32
    return %arg0, %c0_i32 : i32, i32
  }
}

</mosaic_0001>

<bundles_post_ra>
// kernel: transformer_block.1
= control target key start
LH: loop header
LB: loop body
LE: loop exit
PB: predicated region body
PF: predicated region fallthrough
CT: control target
= control target key end

     0   :  { %7 = vsyncpa [#allocation3], 0  ;;  %s3302_s0 = inlined_call_operand.vmem [shape: f32[16,40], index: 0, kind: input, shape index: {}]   ;;  %s3303_s1 = inlined_call_operand.hbm [shape: f32[80,96], index: 1, kind: input, shape index: {}]   ;;  %s3304_s2 = inlined_call_operand.hbm [shape: f32[16,32], index: 2, kind: output, shape index: {}]  }
   0x1   :  { %8 = vsyncpa [#allocation4], 0 }
   0x2   :  { %10 = vsyncpa [#allocation4 + $0x1], 0  ;;  %s3089_s9 = smov 0   ;;  %s3091_s10 = smov 0  }
   0x3   :  { %s3093_s11 = smov 0   ;;  %s3095_s12 = smov 0  }
   0x4 LB: > { %s3110_s13 = sadd.s32 4294967295, %s3057_s12   ;;  %s2855_s14 = sadd.s32 4294967294, %s3057_s12   ;;  %s3057_s12 = sphi %s3095_s12, %s3310_s12   ;;  %s3053_s11 = sphi %s3093_s11, %s3309_s11   ;;  %s3049_s10 = sphi %s3091_s10, %s3308_s10   ;;  %s3045_s9 = sphi %s3089_s9, %s3307_s9  }
   0x5   : > { %s3114_s15 = sadd.s32 1, %s3057_s12   ;;  %s70_s16 = sadd.s32 1, %s3053_s11 }
   0x6   : > { %s67_s17 = ssub.s32 %s3057_s12, %s3114_s15  ;;  %p80_p0 = scmp.ne.s32.totalorder %s3053_s11, %s3049_s10 }
   0x7   : > { %p68_p1 = scmp.eq.s32.totalorder %s67_s17, 0  ;;  %p81_p2 = scmp.eq.s32.totalorder %s3110_s13, 1 }
   0x8   : > { %p86_p3 = scmp.ne.s32.totalorder %s3049_s10, %s3045_s9  ;;  %p87_p4 = scmp.eq.s32.totalorder %s2855_s14, 1 }
   0x9   : > { %s3125_s18 = scalar_select %p68_p1, %s3053_s11, %s70_s16  }
   0xa   : > { %p3127_p5 = por %p81_p2, %p80_p0  ;;  %p3131_p6 = por %p87_p4, %p86_p3 }
   0xb   : > { %p2856_p7 = scmp.ge.s32.totalorder %s3057_s12, 1  ;;  %p94_p8 = scmp.lt.s32.totalorder %s3057_s12, 3 }
   0xc   : > { %p2881_p9 = scmp.eq.s32.totalorder %s3110_s13, 0  ;;  %s105_s23 = sshll.u32 %s3303_s1, 4  ;;  %s106_s23 = int_to_ptr.hbm [resolvable:$true] %s105_s23 }
   0xd   : > { %p95_p10 = pnand %p2856_p7, %p94_p8  ;;  %s3059_s24 = smov [#allocation2]  }
   0xe   : > { %s107_s25 = sshll.u32 %s3059_s24, 4  ;;  %s3060_s26 = smov 128   ;;  %s108_s25 = int_to_ptr.vmem [resolvable:$true] %s107_s25 }
   0xf   : > { %p2873_p11 = pneg %p95_p10  ;;  %s3061_s27 = smov 8  }
  0x10   : > { %130 = sbr.rel (%p95_p10) target bundleno = 3482 (0xd9a), region = 28 }
  0x11   : > { %p2874_p12 = pnand %p2881_p9, %p2873_p11 }
  0x13   : > { %2876 = dma.hbm_to_vmem [thread:$0]  (!%p2874_p12), %s106_s23, 1280, %s108_s25, [#allocation3], %s3060_s26, %s3060_s26, %s3061_s27  }
  0x15   : > { %3036 = dma.done.wait (%p2881_p9), [#allocation3], 1280  }
  0x16   : > { %3038 = vsyncadd (%p2881_p9), [#allocation3], 4294966016  ;;  %p152_p13 = scmp.lt.s32.totalorder %s3110_s13, 1  ;;  %vm162_vm0 = vcmask 326656   ;;  %v161_v0 = vld [vmem:[#allocation2 + $0x20] sm:$0xff]  ;;  %v160_v1 = vld [vmem:[#allocation2 + $0x18] sm:$0xff] }
  0x17   : > { %v159_v2 = vld [vmem:[#allocation2 + $0x10] sm:$0xff]  ;;  %v177_v3 = vand.u32 4294901760, %v161_v0  ;;  %v179_v4 = vand.u32 4294901760, %v160_v1  ;;  %v158_v6 = vld [vmem:[#allocation2 + $0x8] sm:$0xff]  ;;  %v157_v7 = vld [vmem:[#allocation2] sm:$0xff]  ;;  %s3062_s5 = smov 96  }
  0x18   : > { %s153_s28 = scalar_select %p152_p13, %s3110_s13, 1  ;;  %v3154_v5 = vand.u32 4294901760, %v159_v2  ;;  %v183_v9 = vand.u32 4294901760, %v158_v6  ;;  %v185_v10 = vand.u32 4294901760, %v157_v7  ;;  %vm367_vm1 = vcmask 64512  }
  0x19   : > { %v208_v12 = vsub.f32 %v161_v0, %v177_v3  ;;  %178 = vmatpush.msra.mxu0 %v177_v3  ;;  %v214_v13 = vsub.f32 %v160_v1, %v179_v4  ;;  %286 = vmatpush.msra.mxu3 %v177_v3  ;;  %s3063_s6 = smov 120   ;;  %s3064_s7 = smov 104  }
  0x1a   : > { %s2862_s29 = sshll.u32 %s153_s28, 3  ;;  %v220_v14 = vsub.f32 %v159_v2, %v3154_v5  ;;  %v226_v16 = vsub.f32 %v158_v6, %v183_v9  ;;  %v232_v17 = vsub.f32 %v157_v7, %v185_v10  ;;  %s3065_s8 = smov 88  }
  0x1b   : > { %s3152_s4 = scalar_lea.vmem %s3302_s0, %s2862_s29  ;;  %255 = vmatpush.msra.mxu2 %v208_v12  ;;  %180 = vmatpush.msra.mxu0 %v179_v4  ;;  %v209_v18 = vand.u32 4294901760, %v208_v12  ;;  %v215_v19 = vand.u32 4294901760, %v214_v13  ;;  %s3066_s14 = smov 80  }
  0x1c   : > { %v156_v8 = vld [vmem:[%s3152_s4] sm:$0xff]  ;;  %v221_v20 = vand.u32 4294901760, %v220_v14  ;;  %288 = vmatpush.msra.mxu3 %v179_v4  ;;  %v227_v22 = vand.u32 4294901760, %v226_v16  ;;  %v233_v23 = vand.u32 4294901760, %v232_v17  ;;  %s3067_s16 = smov 112   ;;  %s3068_s17 = smov 72  }
  0x1d   : > { %v164_v11 = vsel %vm162_vm0, %v156_v8, 0  ;;  %258 = vmatpush.msra.mxu2 %v214_v13  ;;  %v210_v24 = vsub.f32 %v208_v12, %v209_v18  ;;  %182 = vmatpush.msra.mxu0 %v3154_v5  ;;  %v216_v25 = vsub.f32 %v214_v13, %v215_v19  ;;  %s3069_s21 = smov 64   ;;  %s3070_s22 = smov 56  }
  0x1e   : > { %v187_v15 = vand.u32 4294901760, %v164_v11  ;;  %v222_v26 = vsub.f32 %v220_v14, %v221_v20  ;;  %290 = vmatpush.msra.mxu3 %v3154_v5  ;;  %v228_v30 = vsub.f32 %v226_v16, %v227_v22  ;;  %v234_v34 = vsub.f32 %v232_v17, %v233_v23  ;;  %s3071_s23 = smov 48   ;;  %s3072_s24 = smov 40  }
  0x1f   : > { %v211_v28 = vand.u32 4294901760, %v210_v24  ;;  %261 = vmatpush.msra.mxu2 %v220_v14  ;;  %v217_v29 = vand.u32 4294901760, %v216_v25  ;;  %184 = vmatpush.msra.mxu0 %v183_v9  ;;  %s149_s25 = sand.u32 1, %s3049_s10   ;;  %s2864_s27 = sshll.u32 %s3110_s13, 3 }
  0x20   : > { %v188_v21 = vsub.f32 %v164_v11, %v187_v15  ;;  %292 = vmatpush.msra.mxu3 %v183_v9  ;;  %v223_v32 = vand.u32 4294901760, %v222_v26  ;;  %v229_v35 = vand.u32 4294901760, %v228_v30  ;;  %v235_v36 = vand.u32 4294901760, %v234_v34  ;;  %s2861_s26 = sshll.u32 %s149_s25, 3  ;;  %s2779_s30 = scalar_lea.hbm %s3304_s2, %s2864_s27 }
  0x21   : > { %212 = vmatpush.msra.mxu1 %v211_v28  ;;  %264 = vmatpush.msra.mxu2 %v226_v16  ;;  %s151_s3 = scalar_lea.vmem [#allocation5], %s2861_s26  ;;  %s2769_s13 = scalar_lea.sflag [#allocation4], %s149_s25 }
  0x22   : > { %v189_v27 = vand.u32 4294901760, %v188_v21  ;;  %186 = vmatpush.msra.mxu0 %v185_v10  ;;  %294 = vmatpush.msra.mxu3 %v185_v10 }
  0x23   : > { %218 = vmatpush.msra.mxu1 %v217_v29  ;;  %267 = vmatpush.msra.mxu2 %v232_v17 }
  0x24   : > { %v190_v31 = vsub.f32 %v188_v21, %v189_v27  ;;  %270 = vmatmul.f32.vlgmr.msra.gmra.mxu2 %v188_v21  ;;  %316 = vmatpush.msrb.mxu0 %v209_v18 }
  0x25   : > { %224 = vmatpush.msra.mxu1 %v223_v32  ;;  %298 = vmatmul.f32.vlgmr.msra.gmra.mxu3 %v189_v27 }
  0x26   : > { %v191_v33 = vand.u32 4294901760, %v190_v31  ;;  %320 = vmatpush.msrb.mxu0 %v215_v19 }
  0x27   : > { %230 = vmatpush.msra.mxu1 %v229_v35 }
  0x28   : > { %192 = vmatmul.f32.vlgmr.msra.gmra.mxu0 %v191_v33 }
  0x29   : > { %324 = vmatpush.msrb.mxu0 %v221_v20  ;;  %236 = vmatpush.msra.mxu1 %v235_v36 }
  0x2a   : > { %238 = vmatmul.f32.vlgmr.msra.gmra.mxu1 %v187_v15 }
  0x2b   : > { %328 = vmatpush.msrb.mxu0 %v227_v22  ;;  %350 = vmatpush.msrb.mxu1 %v177_v3 }
  0x2d   : > { %332 = vmatpush.msrb.mxu0 %v233_v23  ;;  %352 = vmatpush.msrb.mxu1 %v179_v4 }
  0x2f   : > { %354 = vmatpush.msrb.mxu1 %v3154_v5 }
  0x30   : > { %334 = vmatmul.f32.vlgmr.msrb.gmra.mxu0 %v187_v15 }
  0x31   : > { %356 = vmatpush.msrb.mxu1 %v183_v9 }
  0x33   : > { %358 = vmatpush.msrb.mxu1 %v185_v10 }
  0x34   : > { %360 = vmatmul.f32.vlgmr.msrb.gmra.mxu1 %v187_v15 }
  0xa5   : > { %v193_v37 = vpop.f32.mrf.mxu0 }
  0xa7   : > { %v239_v38 = vpop.f32.mrf.mxu1  ;;  %v271_v39 = vpop.f32.mrf.mxu2 }
  0xa8   : > { %v240_v40 = vadd.f32 %v239_v38, %v193_v37  ;;  %v299_v41 = vpop.f32.mrf.mxu3 }
  0xaa   : > { %v272_v42 = vadd.f32 %v271_v39, %v240_v40 }
  0xac   : > { %v300_v44 = vadd.f32 %v299_v41, %v272_v42 }
  0xad   : > { %v335_v43 = vpop.f32.mrf.mxu0 }
  0xae   : > { %v336_v45 = vadd.f32 %v335_v43, %v300_v44 }
  0xb1   : > { %v361_v46 = vpop.f32.mrf.mxu1 }
  0xb2   : > { %v3161_v47 = vadd.f32 %v361_v46, %v336_v45 }
  0xb4   : > { %697 = vrot.lane.b32.xlu2 %v3161_v47, %s3062_s5  ;;  %365 = vrot.lane.b32.xlu0 %v3161_v47, %s3063_s6  ;;  %v368_v48 = vsel %vm367_vm1, %v3161_v47, 0 }
  0xb5   : > { %v389_v49 = vand.u32 4294901760, %v368_v48 }
  0xb7   : > { %v390_v50 = vsub.f32 %v368_v48, %v389_v49 }
  0xb9   : > { %v391_v51 = vand.u32 4294901760, %v390_v50 }
  0xbb   : > { %v392_v54 = vsub.f32 %v390_v50, %v391_v51 }
  0xbc   : > { %695 = vrot.lane.b32.xlu2 %v3161_v47, %s3064_s7 }
  0xbd   : > { %v393_v57 = vand.u32 4294901760, %v392_v54 }
 0x10e   : > { %v698_v15 = vpop.permute.xlu2 %697 }
 0x10f   : > { %v701_v17 = vsel %vm367_vm1, %v698_v15, 0 }
 0x110   : > { %v718_v20 = vand.u32 4294901760, %v701_v17 }
 0x112   : > { %v745_v26 = vsub.f32 %v701_v17, %v718_v20 }
 0x114   : > { %v746_v32 = vand.u32 4294901760, %v745_v26 }
 0x116   : > { %v696_v24 = vpop.permute.xlu2 %695  ;;  %v747_v36 = vsub.f32 %v745_v26, %v746_v32 }
 0x117   : > { %v699_v29 = vsel %vm367_vm1, %v696_v24, 0 }
 0x118   : > { %v720_v33 = vand.u32 4294901760, %v699_v29  ;;  %v748_v43 = vand.u32 4294901760, %v747_v36 }
 0x11a   : > { %v721_v38 = vsub.f32 %v699_v29, %v720_v33 }
 0x11c   : > { %v722_v48 = vand.u32 4294901760, %v721_v38 }
 0x126   : > { %v366_v52 = vpop.permute.xlu0 %365 }
 0x127   : > { %v370_v53 = vsel %vm367_vm1, %v366_v52, 0 }
 0x128   : > { %v387_v55 = vand.u32 4294901760, %v370_v53 }
 0x12a   : > { %v414_v56 = vsub.f32 %v370_v53, %v387_v55  ;;  %388 = vmatpush.xpose.msrb.mxu2 %v387_v55  ;;  %512 = vmatpush.xpose.msra.mxu1 %v387_v55  ;;  %v723_v53 = vsub.f32 %v721_v38, %v722_v48 }
 0x12c   : > { %v415_v58 = vand.u32 4294901760, %v414_v56 }
 0x12d   : > { %394 = vmatmul.f32.vlgmr.msrb.gmra.mxu2 %v393_v57  ;;  %514 = vmatmul.f32.vlgmr.msra.gmra.mxu1 %v389_v49 }
 0x12e   : > { %441 = vmatpush.xpose.msra.mxu2 %v414_v56  ;;  %490 = vmatpush.xpose.msra.mxu0 %v415_v58  ;;  %v416_v59 = vsub.f32 %v414_v56, %v415_v58  ;;  %v724_v56 = vand.u32 4294901760, %v723_v53 }
 0x130   : > { %v417_v60 = vand.u32 4294901760, %v416_v59 }
 0x131   : > { %492 = vmatmul.f32.vlgmr.msra.gmra.mxu0 %v389_v49 }
 0x132   : > { %418 = vmatpush.xpose.msrb.mxu3 %v417_v60 }
 0x135   : > { %420 = vmatmul.f32.vlgmr.msrb.gmra.mxu3 %v389_v49  ;;  %444 = vmatmul.f32.vlgmr.msra.gmra.mxu2 %v390_v50 }
 0x136   : > { %464 = vmatpush.xpose.msra.mxu3 %v387_v55 }
 0x13d   : > { %468 = vmatmul.f32.vlgmr.msra.gmra.mxu3 %v391_v51 }
 0x1aa   : > { %v515_v6 = vpop.f32.mrf.mxu1 }
 0x1ae   : > { %v493_v4 = vpop.f32.mrf.mxu0 }
 0x1b0   : > { %v395_v61 = vpop.f32.mrf.mxu2 }
 0x1b8   : > { %v421_v62 = vpop.f32.mrf.mxu3  ;;  %v445_v0 = vpop.f32.mrf.mxu2 }
 0x1b9   : > { %v422_v63 = vadd.f32 %v421_v62, %v395_v61 }
 0x1bb   : > { %v446_v1 = vadd.f32 %v445_v0, %v422_v63 }
 0x1c0   : > { %v469_v2 = vpop.f32.mrf.mxu3 }
 0x1c1   : > { %v470_v3 = vadd.f32 %v469_v2, %v446_v1 }
 0x1c3   : > { %v494_v5 = vadd.f32 %v493_v4, %v470_v3 }
 0x1c5   : > { %v516_v7 = vadd.f32 %v515_v6, %v494_v5 }
 0x1c7   : > { %v518_v8 = vsel %vm367_vm1, %v516_v7, -inf }
 0x1c8   : > { %519 = vmax.xlane.f32.xlu0 %v518_v8 }
 0x1dc   : > { %873 = vrot.lane.b32.xlu0 %v3161_v47, %s3065_s8 }
 0x1e4   : > { %1324 = vrot.lane.b32.xlu0 %v3161_v47, %s3066_s14 }
 0x23b   : > { %v520_v9 = vpop.xlane.xlu0 %519 }
 0x23c   : > { %v521_v10 = vsub.f32 %v516_v7, %v520_v9 }
 0x23e   : > { %v522_v11 = vmul.f32 1.442695, %v521_v10 }
 0x240   : > { %2938 = vpow2.f32 %v522_v11 }
 0x246   : > { %v2939_v12 = vpop.eup %2938 }
 0x247   : > { %v524_v13 = vsel %vm367_vm1, %v2939_v12, 0.0 }
 0x248   : > { %525 = vadd.xlane.f32.xlu1 %v524_v13 }
 0x24e   : > { %v874_v39 = vpop.permute.xlu0 %873 }
 0x24f   : > { %v894_v44 = vand.u32 4294901760, %v874_v39 }
 0x251   : > { %v921_v51 = vsub.f32 %v874_v39, %v894_v44 }
 0x253   : > { %v922_v55 = vand.u32 4294901760, %v921_v51 }
 0x255   : > { %v923_v57 = vsub.f32 %v921_v51, %v922_v55 }
 0x257   : > { %v924_v58 = vand.u32 4294901760, %v923_v57 }
 0x261   : > { %542 = vrot.lane.b32.xlu1 %v3161_v47, %s3067_s16  ;;  %s3011_s16 = scalar_lea.hbm %s3304_s2, 16 }
 0x2bb   : > { %v526_v14 = vpop.xlane.xlu1 %525 }
 0x2bc   : > { %2940 = vrcp.f32 %v526_v14  ;;  %v538_v21 = vand.u32 2147483648, %v526_v14  ;;  %v536_v23 = vand.u32 2147483647, %v526_v14  ;;  %vm532_vm3 = vweird.f32 %v526_v14 }
 0x2be   : > { %v539_v27 = vor.u32 1.1754944e-38, %v538_v21  ;;  %vm537_vm5 = vcmp.eq.f32.partialorder %v536_v23, 8.507059e+37 }
 0x2c2   : > { %v2941_v16 = vpop.eup %2940 }
 0x2c3   : > { %v528_v18 = vmul.f32 %v2941_v16, %v526_v14  ;;  %vm533_vm2 = vweird.f32 %v2941_v16 }
 0x2c4   : > { %vm534_vm4 = vmor %vm532_vm3, %vm533_vm2 }
 0x2c5   : > { %v529_v19 = vsub.f32 1.0, %v528_v18 }
 0x2c7   : > { %v530_v22 = vmul.f32 %v2941_v16, %v529_v19 }
 0x2c9   : > { %v531_v25 = vadd.f32 %v2941_v16, %v530_v22 }
 0x2cb   : > { %v535_v28 = vsel %vm534_vm4, %v2941_v16, %v531_v25 }
 0x2cc   : > { %v540_v30 = vsel %vm537_vm5, %v539_v27, %v535_v28 }
 0x2cd   : > { %v541_v31 = vmul.f32 %v2939_v12, %v540_v30 }
 0x2cf   : > { %v546_v34 = vsel %vm367_vm1, %v541_v31, 0 }
 0x2d0   : > { %v565_v35 = vand.u32 4294901760, %v546_v34 }
 0x2d2   : > { %v566_v37 = vsub.f32 %v546_v34, %v565_v35 }
 0x2d3   : > { %v543_v40 = vpop.permute.xlu1 %542 }
 0x2d4   : > { %v563_v41 = vand.u32 4294901760, %v543_v40  ;;  %v567_v42 = vand.u32 4294901760, %v566_v37 }
 0x2d6   : > { %v590_v45 = vsub.f32 %v543_v40, %v563_v41  ;;  %564 = vmatpush.msrb.mxu2 %v563_v41  ;;  %640 = vmatpush.msrb.mxu1 %v563_v41  ;;  %v568_v46 = vsub.f32 %v566_v37, %v567_v42 }
 0x2d7   : > { %644 = vmatmul.f32.vlgmr.msrb.gmra.mxu1 %v567_v42 }
 0x2d8   : > { %v591_v49 = vand.u32 4294901760, %v590_v45  ;;  %749 = vmatpush.xpose.msra.mxu1 %v748_v43  ;;  %617 = vmatpush.msrb.mxu0 %v590_v45  ;;  %v569_v50 = vand.u32 4294901760, %v568_v46 }
 0x2d9   : > { %620 = vmatmul.f32.vlgmr.msrb.gmra.mxu0 %v566_v37 }
 0x2da   : > { %v592_v52 = vsub.f32 %v590_v45, %v591_v49  ;;  %719 = vmatpush.xpose.msra.mxu0 %v718_v20  ;;  %570 = vmatmul.f32.vlgmr.msrb.gmra.mxu2 %v569_v50 }
 0x2db   : > { %666 = vmatpush.msra.mxu2 %v591_v49 }
 0x2dc   : > { %843 = vmatpush.xpose.msrb.mxu1 %v718_v20  ;;  %v593_v54 = vand.u32 4294901760, %v592_v52 }
 0x2dd   : > { %772 = vmatpush.xpose.msrb.mxu2 %v745_v26 }
 0x2de   : > { %821 = vmatpush.xpose.msrb.mxu0 %v746_v32  ;;  %594 = vmatpush.msrb.mxu3 %v593_v54 }
 0x2df   : > { %596 = vmatmul.f32.vlgmr.msrb.gmra.mxu3 %v565_v35  ;;  %751 = vmatmul.f32.vlgmr.msra.gmra.mxu1 %v720_v33 }
 0x2e0   : > { %688 = vmatpush.msra.mxu3 %v563_v41  ;;  %971 = vmatpush.msra.mxu1 %v894_v44  ;;  %v3187_v41 = vld [vmem:[#allocation2 + $0x30] sm:$0xff] }
 0x2e1   : > { %725 = vmatmul.f32.vlgmr.msra.gmra.mxu0 %v724_v56  ;;  %v1044_v42 = vand.u32 4294901760, %v3187_v41 }
 0x2e2   : > { %795 = vmatpush.xpose.msrb.mxu3 %v718_v20  ;;  %948 = vmatpush.msra.mxu0 %v921_v51 }
 0x2e3   : > { %668 = vmatmul.f32.vlgmr.msra.gmra.mxu2 %v565_v35  ;;  %v1071_v43 = vsub.f32 %v3187_v41, %v1044_v42 }
 0x2e4   : > { %895 = vmatpush.msra.mxu2 %v894_v44 }
 0x2e7   : > { %690 = vmatmul.f32.vlgmr.msra.gmra.mxu3 %v565_v35  ;;  %845 = vmatmul.f32.vlgmr.msrb.gmra.mxu1 %v720_v33 }
 0x2e8   : > { %925 = vmatpush.msra.mxu3 %v924_v58 }
 0x2e9   : > { %823 = vmatmul.f32.vlgmr.msrb.gmra.mxu0 %v720_v33 }
 0x2ea   : > { %1045 = vmatpush.msrb.mxu0 %v1044_v42 }
 0x2eb   : > { %775 = vmatmul.f32.vlgmr.msrb.gmra.mxu2 %v721_v38 }
 0x2ec   : > { %997 = vmatpush.msrb.mxu2 %v922_v55 }
 0x2ef   : > { %799 = vmatmul.f32.vlgmr.msrb.gmra.mxu3 %v722_v48  ;;  %v3191_v48 = vld [vmem:[#allocation2 + $0x28] sm:$0xff] }
 0x2f0   : > { %1019 = vmatpush.msrb.mxu3 %v894_v44  ;;  %v1072_v44 = vand.u32 4294901760, %v1071_v43  ;;  %v1193_v49 = vand.u32 4294901760, %v3191_v48 }
 0x2f2   : > { %v1073_v45 = vsub.f32 %v1071_v43, %v1072_v44  ;;  %v1220_v50 = vsub.f32 %v3191_v48, %v1193_v49 }
 0x2f4   : > { %v1074_v46 = vand.u32 4294901760, %v1073_v45  ;;  %v1221_v51 = vand.u32 4294901760, %v1220_v50 }
 0x2f6   : > { %1075 = vmatpush.msrb.mxu1 %v1074_v46  ;;  %v1222_v52 = vsub.f32 %v1220_v50, %v1221_v51 }
 0x2f8   : > { %v1223_v53 = vand.u32 4294901760, %v1222_v52 }
 0x354   : > { %v645_v61 = vpop.f32.mrf.mxu1 }
 0x356   : > { %v621_v60 = vpop.f32.mrf.mxu0 }
 0x35c   : > { %v752_v7 = vpop.f32.mrf.mxu1 }
 0x35d   : > { %v571_v59 = vpop.f32.mrf.mxu2 }
 0x35e   : > { %v726_v4 = vpop.f32.mrf.mxu0 }
 0x35f   : > { %v753_v9 = vadd.f32 %v752_v7, %v726_v4 }
 0x362   : > { %v597_v62 = vpop.f32.mrf.mxu3 }
 0x363   : > { %v598_v63 = vadd.f32 %v597_v62, %v571_v59 }
 0x364   : > { %v846_v15 = vpop.f32.mrf.mxu1 }
 0x365   : > { %v622_v0 = vadd.f32 %v621_v60, %v598_v63 }
 0x366   : > { %v669_v1 = vpop.f32.mrf.mxu2  ;;  %v824_v13 = vpop.f32.mrf.mxu0 }
 0x367   : > { %v646_v2 = vadd.f32 %v645_v61, %v622_v0 }
 0x369   : > { %v670_v3 = vadd.f32 %v669_v1, %v646_v2 }
 0x36a   : > { %v691_v5 = vpop.f32.mrf.mxu3 }
 0x36b   : > { %v3178_v6 = vadd.f32 %v691_v5, %v670_v3 }
 0x36d   : > { %v1176_v61 = vsel %vm367_vm1, %v3178_v6, 0 }
 0x36e   : > { %v776_v8 = vpop.f32.mrf.mxu2  ;;  %v1195_v1 = vand.u32 4294901760, %v1176_v61 }
 0x36f   : > { %v777_v10 = vadd.f32 %v776_v8, %v753_v9 }
 0x370   : > { %v1196_v8 = vsub.f32 %v1176_v61, %v1195_v1 }
 0x372   : > { %v800_v11 = vpop.f32.mrf.mxu3 }
 0x373   : > { %v801_v12 = vadd.f32 %v800_v11, %v777_v10 }
 0x375   : > { %v825_v14 = vadd.f32 %v824_v13, %v801_v12  ;;  %v1197_v12 = vand.u32 4294901760, %v1196_v8 }
 0x377   : > { %v847_v16 = vadd.f32 %v846_v15, %v825_v14 }
 0x379   : > { %v849_v17 = vsel %vm367_vm1, %v847_v16, -inf }
 0x37a   : > { %850 = vmax.xlane.f32.xlu2 %v849_v17 }
 0x392   : > { %1326 = vrot.lane.b32.xlu2 %v3161_v47, %s3068_s17 }
 0x39a   : > { %1502 = vrot.lane.b32.xlu2 %v3161_v47, %s3069_s21 }
 0x3a2   : > { %1805 = vrot.lane.b32.xlu2 %v3161_v47, %s3070_s22 }
 0x3ed   : > { %v851_v18 = vpop.xlane.xlu2 %850 }
 0x3ee   : > { %v852_v19 = vsub.f32 %v847_v16, %v851_v18  ;;  %v1198_v18 = vsub.f32 %v1196_v8, %v1197_v12 }
 0x3f0   : > { %v853_v20 = vmul.f32 1.442695, %v852_v19 }
 0x3f2   : > { %2942 = vpow2.f32 %v853_v20 }
 0x3f5   : > { %v1327_v56 = vpop.permute.xlu2 %1326 }
 0x3f6   : > { %v1330_v60 = vsel %vm367_vm1, %v1327_v56, 0 }
 0x3f7   : > { %v1347_v63 = vand.u32 4294901760, %v1330_v60 }
 0x3f8   : > { %v2943_v21 = vpop.eup %2942 }
 0x3f9   : > { %v855_v22 = vsel %vm367_vm1, %v2943_v21, 0.0  ;;  %v1374_v5 = vsub.f32 %v1330_v60, %v1347_v63 }
 0x3fa   : > { %856 = vadd.xlane.f32.xlu1 %v855_v22  ;;  %v1325_v22 = vpop.permute.xlu0 %1324 }
 0x3fb   : > { %v1375_v11 = vand.u32 4294901760, %v1374_v5 }
 0x3fd   : > { %v1503_v13 = vpop.permute.xlu2 %1502  ;;  %v1376_v15 = vsub.f32 %v1374_v5, %v1375_v11 }
 0x3fe   : > { %v1523_v16 = vand.u32 4294901760, %v1503_v13 }
 0x3ff   : > { %v1377_v20 = vand.u32 4294901760, %v1376_v15 }
 0x46d   : > { %v857_v23 = vpop.xlane.xlu1 %856 }
 0x46e   : > { %2944 = vrcp.f32 %v857_v23  ;;  %v869_v27 = vand.u32 2147483648, %v857_v23  ;;  %v867_v29 = vand.u32 2147483647, %v857_v23  ;;  %vm863_vm7 = vweird.f32 %v857_v23 }
 0x470   : > { %v870_v31 = vor.u32 1.1754944e-38, %v869_v27  ;;  %vm868_vm9 = vcmp.eq.f32.partialorder %v867_v29, 8.507059e+37 }
 0x474   : > { %v2945_v24 = vpop.eup %2944 }
 0x475   : > { %v859_v25 = vmul.f32 %v2945_v24, %v857_v23  ;;  %vm864_vm6 = vweird.f32 %v2945_v24  ;;  %v1199_v23 = vand.u32 4294901760, %v1198_v18 }
 0x476   : > { %vm865_vm8 = vmor %vm863_vm7, %vm864_vm6 }
 0x477   : > { %v860_v26 = vsub.f32 1.0, %v859_v25 }
 0x479   : > { %v861_v28 = vmul.f32 %v2945_v24, %v860_v26 }
 0x47b   : > { %v862_v30 = vadd.f32 %v2945_v24, %v861_v28 }
 0x47d   : > { %v866_v32 = vsel %vm865_vm8, %v2945_v24, %v862_v30  ;;  %v1328_v24 = vsel %vm367_vm1, %v1325_v22, 0 }
 0x47e   : > { %v871_v33 = vsel %vm868_vm9, %v870_v31, %v866_v32  ;;  %v1349_v26 = vand.u32 4294901760, %v1328_v24 }
 0x47f   : > { %v872_v34 = vmul.f32 %v2943_v21, %v871_v33  ;;  %v1550_v21 = vsub.f32 %v1503_v13, %v1523_v16  ;;  %v3206_v13 = vld [vmem:[#allocation2 + $0x38] sm:$0xff] }
 0x480   : > { %v1350_v28 = vsub.f32 %v1328_v24, %v1349_v26 }
 0x481   : > { %v877_v35 = vsel %vm367_vm1, %v872_v34, 0  ;;  %v1551_v25 = vand.u32 4294901760, %v1550_v21 }
 0x482   : > { %v896_v36 = vand.u32 4294901760, %v877_v35  ;;  %v1351_v30 = vand.u32 4294901760, %v1350_v28 }
 0x483   : > { %v1552_v27 = vsub.f32 %v1550_v21, %v1551_v25 }
 0x484   : > { %927 = vmatmul.f32.vlgmr.msra.gmra.mxu3 %v896_v36  ;;  %v897_v37 = vsub.f32 %v877_v35, %v896_v36  ;;  %v1352_v31 = vsub.f32 %v1350_v28, %v1351_v30 }
 0x485   : > { %1121 = vmatpush.msra.mxu3 %v1044_v42  ;;  %v1553_v29 = vand.u32 4294901760, %v1552_v27 }
 0x486   : > { %951 = vmatmul.f32.vlgmr.msra.gmra.mxu0 %v897_v37  ;;  %v898_v38 = vand.u32 4294901760, %v897_v37  ;;  %v1353_v32 = vand.u32 4294901760, %v1352_v31 }
 0x487   : > { %1147 = vmatpush.msra.mxu0 %v1072_v44 }
 0x488   : > { %975 = vmatmul.f32.vlgmr.msra.gmra.mxu1 %v898_v38  ;;  %v899_v39 = vsub.f32 %v897_v37, %v898_v38 }
 0x489   : > { %1169 = vmatpush.msra.mxu1 %v1044_v42 }
 0x48a   : > { %v900_v40 = vand.u32 4294901760, %v899_v39 }
 0x48c   : > { %901 = vmatmul.f32.vlgmr.msra.gmra.mxu2 %v900_v40  ;;  %1021 = vmatmul.f32.vlgmr.msrb.gmra.mxu3 %v896_v36 }
 0x48d   : > { %1098 = vmatpush.msra.mxu2 %v1071_v43  ;;  %1224 = vmatpush.msrb.mxu3 %v1223_v53 }
 0x494   : > { %999 = vmatmul.f32.vlgmr.msrb.gmra.mxu2 %v896_v36 }
 0x495   : > { %1194 = vmatpush.msrb.mxu2 %v1193_v49 }
 0x503   : > { %v952_v58 = vpop.f32.mrf.mxu0 }
 0x505   : > { %v976_v62 = vpop.f32.mrf.mxu1 }
 0x507   : > { %v928_v54 = vpop.f32.mrf.mxu3 }
 0x50f   : > { %v902_v55 = vpop.f32.mrf.mxu2  ;;  %v1022_v4 = vpop.f32.mrf.mxu3 }
 0x510   : > { %v929_v57 = vadd.f32 %v928_v54, %v902_v55 }
 0x512   : > { %v953_v59 = vadd.f32 %v952_v58, %v929_v57 }
 0x514   : > { %v977_v0 = vadd.f32 %v976_v62, %v953_v59 }
 0x517   : > { %v1000_v2 = vpop.f32.mrf.mxu2 }
 0x518   : > { %v1001_v3 = vadd.f32 %v1000_v2, %v977_v0 }
 0x51a   : > { %v1023_v7 = vadd.f32 %v1022_v4, %v1001_v3 }
 0x51c   : > { %v1027_v9 = vsel %vm367_vm1, %v1023_v7, 0 }
 0x51d   : > { %v1046_v10 = vand.u32 4294901760, %v1027_v9 }
 0x51f   : > { %v1047_v14 = vsub.f32 %v1027_v9, %v1046_v10  ;;  %1077 = vmatmul.f32.vlgmr.msrb.gmra.mxu1 %v1046_v10 }
 0x520   : > { %1270 = vmatpush.msrb.mxu1 %v1193_v49 }
 0x521   : > { %1101 = vmatmul.f32.vlgmr.msra.gmra.mxu2 %v1047_v14  ;;  %v1048_v6 = vand.u32 4294901760, %v1047_v14 }
 0x522   : > { %1296 = vmatpush.msra.mxu2 %v1221_v51 }
 0x523   : > { %1125 = vmatmul.f32.vlgmr.msra.gmra.mxu3 %v1048_v6  ;;  %v1049_v17 = vsub.f32 %v1047_v14, %v1048_v6  ;;  %v1673_v14 = vand.u32 4294901760, %v3206_v13 }
 0x524   : > { %1318 = vmatpush.msra.mxu3 %v1193_v49 }
 0x525   : > { %v1050_v19 = vand.u32 4294901760, %v1049_v17 }
 0x527   : > { %1051 = vmatmul.f32.vlgmr.msrb.gmra.mxu0 %v1050_v19  ;;  %1171 = vmatmul.f32.vlgmr.msra.gmra.mxu1 %v1046_v10 }
 0x528   : > { %1378 = vmatpush.xpose.msra.mxu1 %v1377_v20  ;;  %1247 = vmatpush.msrb.mxu0 %v1220_v50 }
 0x529   : > { %1200 = vmatmul.f32.vlgmr.msrb.gmra.mxu2 %v1199_v23 }
 0x52a   : > { %1401 = vmatpush.xpose.msrb.mxu2 %v1374_v5 }
 0x52b   : > { %1226 = vmatmul.f32.vlgmr.msrb.gmra.mxu3 %v1195_v1 }
 0x52c   : > { %1424 = vmatpush.xpose.msrb.mxu3 %v1347_v63 }
 0x52f   : > { %1149 = vmatmul.f32.vlgmr.msra.gmra.mxu0 %v1046_v10  ;;  %1274 = vmatmul.f32.vlgmr.msrb.gmra.mxu1 %v1197_v12 }
 0x530   : > { %1348 = vmatpush.xpose.msra.mxu0 %v1347_v63  ;;  %1472 = vmatpush.xpose.msrb.mxu1 %v1347_v63 }
 0x531   : > { %1298 = vmatmul.f32.vlgmr.msra.gmra.mxu2 %v1195_v1 }
 0x532   : > { %1524 = vmatpush.msra.mxu2 %v1523_v16 }
 0x533   : > { %1320 = vmatmul.f32.vlgmr.msra.gmra.mxu3 %v1195_v1 }
 0x534   : > { %1554 = vmatpush.msra.mxu3 %v1553_v29 }
 0x537   : > { %1250 = vmatmul.f32.vlgmr.msrb.gmra.mxu0 %v1196_v8  ;;  %1380 = vmatmul.f32.vlgmr.msra.gmra.mxu1 %v1349_v26 }
 0x538   : > { %1450 = vmatpush.xpose.msrb.mxu0 %v1375_v11  ;;  %1600 = vmatpush.msra.mxu1 %v1523_v16 }
 0x539   : > { %1404 = vmatmul.f32.vlgmr.msrb.gmra.mxu2 %v1350_v28 }
 0x53a   : > { %1626 = vmatpush.msrb.mxu2 %v1551_v25 }
 0x53b   : > { %1428 = vmatmul.f32.vlgmr.msrb.gmra.mxu3 %v1351_v30 }
 0x53c   : > { %1648 = vmatpush.msrb.mxu3 %v1523_v16 }
 0x53f   : > { %1354 = vmatmul.f32.vlgmr.msra.gmra.mxu0 %v1353_v32  ;;  %1474 = vmatmul.f32.vlgmr.msrb.gmra.mxu1 %v1349_v26 }
 0x540   : > { %1577 = vmatpush.msra.mxu0 %v1550_v21 }
 0x547   : > { %1452 = vmatmul.f32.vlgmr.msrb.gmra.mxu0 %v1349_v26 }
 0x548   : > { %1674 = vmatpush.msrb.mxu0 %v1673_v14 }
 0x59c   : > { %v1078_v33 = vpop.f32.mrf.mxu1 }
 0x5a4   : > { %v1052_v34 = vpop.f32.mrf.mxu0  ;;  %v1102_v35 = vpop.f32.mrf.mxu2 }
 0x5a5   : > { %v1079_v36 = vadd.f32 %v1078_v33, %v1052_v34  ;;  %v1172_v39 = vpop.f32.mrf.mxu1 }
 0x5a6   : > { %v1126_v37 = vpop.f32.mrf.mxu3 }
 0x5a7   : > { %v1103_v38 = vadd.f32 %v1102_v35, %v1079_v36  ;;  %v1700_v36 = vsub.f32 %v3206_v13, %v1673_v14 }
 0x5a9   : > { %v1127_v40 = vadd.f32 %v1126_v37, %v1103_v38 }
 0x5ac   : > { %v1150_v42 = vpop.f32.mrf.mxu0  ;;  %v1201_v43 = vpop.f32.mrf.mxu2 }
 0x5ad   : > { %v1151_v44 = vadd.f32 %v1150_v42, %v1127_v40  ;;  %v1275_v50 = vpop.f32.mrf.mxu1 }
 0x5ae   : > { %v1227_v45 = vpop.f32.mrf.mxu3 }
 0x5af   : > { %v1173_v46 = vadd.f32 %v1172_v39, %v1151_v44  ;;  %v1701_v39 = vand.u32 4294901760, %v1700_v36 }
 0x5b1   : > { %v1202_v49 = vadd.f32 %v1201_v43, %v1173_v46  ;;  %v1702_v40 = vsub.f32 %v1700_v36, %v1701_v39  ;;  %v1806_v46 = vpop.permute.xlu2 %1805 }
 0x5b3   : > { %v1228_v51 = vadd.f32 %v1227_v45, %v1202_v49  ;;  %v1703_v42 = vand.u32 4294901760, %v1702_v40 }
 0x5b4   : > { %v1251_v52 = vpop.f32.mrf.mxu0  ;;  %v1299_v53 = vpop.f32.mrf.mxu2 }
 0x5b5   : > { %v1252_v54 = vadd.f32 %v1251_v52, %v1228_v51  ;;  %v1381_v59 = vpop.f32.mrf.mxu1  ;;  %1704 = vmatpush.msrb.mxu1 %v1703_v42  ;;  %v1809_v52 = vsel %vm367_vm1, %v1806_v46, 0 }
 0x5b6   : > { %v1321_v56 = vpop.f32.mrf.mxu3 }
 0x5b7   : > { %v1276_v55 = vadd.f32 %v1275_v50, %v1252_v54 }
 0x5b9   : > { %v1300_v57 = vadd.f32 %v1299_v53, %v1276_v55 }
 0x5bb   : > { %v3200_v58 = vadd.f32 %v1321_v56, %v1300_v57  ;;  %v1830_v56 = vand.u32 4294901760, %v1809_v52 }
 0x5bc   : > { %v1355_v60 = vpop.f32.mrf.mxu0  ;;  %v1405_v62 = vpop.f32.mrf.mxu2 }
 0x5bd   : > { %v1382_v61 = vadd.f32 %v1381_v59, %v1355_v60  ;;  %v1475_v4 = vpop.f32.mrf.mxu1 }
 0x5be   : > { %v1429_v0 = vpop.f32.mrf.mxu3 }
 0x5bf   : > { %v1406_v63 = vadd.f32 %v1405_v62, %v1382_v61 }
 0x5c1   : > { %v1430_v1 = vadd.f32 %v1429_v0, %v1406_v63  ;;  %v1831_v63 = vsub.f32 %v1809_v52, %v1830_v56 }
 0x5c4   : > { %v1453_v2 = vpop.f32.mrf.mxu0 }
 0x5c5   : > { %v1454_v3 = vadd.f32 %v1453_v2, %v1430_v1 }
 0x5c7   : > { %v1476_v5 = vadd.f32 %v1475_v4, %v1454_v3  ;;  %v1832_v3 = vand.u32 4294901760, %v1831_v63 }
 0x5c9   : > { %v1478_v7 = vsel %vm367_vm1, %v1476_v5, -inf }
 0x5ca   : > { %1479 = vmax.xlane.f32.xlu1 %v1478_v7 }
 0x5e3   : > { %1807 = vrot.lane.b32.xlu1 %v3161_v47, %s3071_s23 }
 0x63d   : > { %v1480_v8 = vpop.xlane.xlu1 %1479 }
 0x63e   : > { %v1481_v9 = vsub.f32 %v1476_v5, %v1480_v8  ;;  %v1833_v8 = vsub.f32 %v1831_v63, %v1832_v3 }
 0x640   : > { %v1482_v10 = vmul.f32 1.442695, %v1481_v9 }
 0x642   : > { %2946 = vpow2.f32 %v1482_v10 }
 0x648   : > { %v2947_v11 = vpop.eup %2946 }
 0x649   : > { %v1484_v12 = vsel %vm367_vm1, %v2947_v11, 0.0 }
 0x64a   : > { %1485 = vadd.xlane.f32.xlu0 %v1484_v12  ;;  %v1834_v12 = vand.u32 4294901760, %v1833_v8 }
 0x655   : > { %v1808_v16 = vpop.permute.xlu1 %1807 }
 0x656   : > { %v1811_v19 = vsel %vm367_vm1, %v1808_v16, 0 }
 0x657   : > { %v3210_v23 = vand.u32 4294901760, %v1811_v19 }
 0x659   : > { %v3213_v27 = vsub.f32 %v1811_v19, %v3210_v23 }
 0x65b   : > { %v1856_v31 = vand.u32 4294901760, %v3213_v27 }
 0x65d   : > { %v1857_v34 = vsub.f32 %v3213_v27, %v1856_v31 }
 0x65e   : > { %1983 = vrot.lane.b32.xlu0 %v3161_v47, %s3072_s24 }
 0x65f   : > { %v1858_v38 = vand.u32 4294901760, %v1857_v34 }
 0x6bd   : > { %v1486_v6 = vpop.xlane.xlu0 %1485 }
 0x6be   : > { %2948 = vrcp.f32 %v1486_v6  ;;  %v1498_v20 = vand.u32 2147483648, %v1486_v6  ;;  %v1496_v22 = vand.u32 2147483647, %v1486_v6  ;;  %vm1492_vm11 = vweird.f32 %v1486_v6 }
 0x6c0   : > { %v1499_v24 = vor.u32 1.1754944e-38, %v1498_v20  ;;  %vm1497_vm13 = vcmp.eq.f32.partialorder %v1496_v22, 8.507059e+37 }
 0x6c4   : > { %v2949_v15 = vpop.eup %2948 }
 0x6c5   : > { %v1488_v17 = vmul.f32 %v2949_v15, %v1486_v6  ;;  %vm1493_vm10 = vweird.f32 %v2949_v15 }
 0x6c6   : > { %vm1494_vm12 = vmor %vm1492_vm11, %vm1493_vm10 }
 0x6c7   : > { %v1489_v18 = vsub.f32 1.0, %v1488_v17 }
 0x6c9   : > { %v1490_v21 = vmul.f32 %v2949_v15, %v1489_v18 }
 0x6cb   : > { %v1491_v47 = vadd.f32 %v2949_v15, %v1490_v21 }
 0x6cd   : > { %v1495_v25 = vsel %vm1494_vm12, %v2949_v15, %v1491_v47 }
 0x6ce   : > { %v1500_v26 = vsel %vm1497_vm13, %v1499_v24, %v1495_v25 }
 0x6cf   : > { %v1501_v28 = vmul.f32 %v2947_v11, %v1500_v26 }
 0x6d0   : > { %v1984_v51 = vpop.permute.xlu0 %1983 }
 0x6d1   : > { %v1506_v29 = vsel %vm367_vm1, %v1501_v28, 0  ;;  %v2004_v54 = vand.u32 4294901760, %v1984_v51 }
 0x6d2   : > { %v1525_v30 = vand.u32 4294901760, %v1506_v29 }
 0x6d3   : > { %v2031_v61 = vsub.f32 %v1984_v51, %v2004_v54 }
 0x6d4   : > { %1556 = vmatmul.f32.vlgmr.msra.gmra.mxu3 %v1525_v30  ;;  %v1526_v32 = vsub.f32 %v1506_v29, %v1525_v30 }
 0x6d5   : > { %1750 = vmatpush.msra.mxu3 %v1673_v14  ;;  %v2032_v2 = vand.u32 4294901760, %v2031_v61 }
 0x6d6   : > { %1580 = vmatmul.f32.vlgmr.msra.gmra.mxu0 %v1526_v32  ;;  %v1527_v33 = vand.u32 4294901760, %v1526_v32 }
 0x6d7   : > { %1776 = vmatpush.msra.mxu0 %v1701_v39  ;;  %v2033_v7 = vsub.f32 %v2031_v61, %v2032_v2 }
 0x6d8   : > { %1604 = vmatmul.f32.vlgmr.msra.gmra.mxu1 %v1527_v33  ;;  %v1528_v35 = vsub.f32 %v1526_v32, %v1527_v33 }
 0x6d9   : > { %1798 = vmatpush.msra.mxu1 %v1673_v14  ;;  %v2034_v11 = vand.u32 4294901760, %v2033_v7 }
 0x6da   : > { %v1529_v37 = vand.u32 4294901760, %v1528_v35 }
 0x6dc   : > { %1530 = vmatmul.f32.vlgmr.msra.gmra.mxu2 %v1529_v37  ;;  %1650 = vmatmul.f32.vlgmr.msrb.gmra.mxu3 %v1525_v30 }
 0x6dd   : > { %1859 = vmatpush.xpose.msrb.mxu3 %v1858_v38  ;;  %1727 = vmatpush.msra.mxu2 %v1700_v36 }
 0x6e4   : > { %1628 = vmatmul.f32.vlgmr.msrb.gmra.mxu2 %v1525_v30 }
 0x6e5   : > { %1829 = vmatpush.xpose.msrb.mxu2 %v3210_v23 }
 0x753   : > { %v1581_v49 = vpop.f32.mrf.mxu0 }
 0x755   : > { %v1605_v53 = vpop.f32.mrf.mxu1 }
 0x757   : > { %v1557_v43 = vpop.f32.mrf.mxu3 }
 0x75f   : > { %v1531_v44 = vpop.f32.mrf.mxu2  ;;  %v1651_v60 = vpop.f32.mrf.mxu3 }
 0x760   : > { %v1558_v45 = vadd.f32 %v1557_v43, %v1531_v44 }
 0x762   : > { %v1582_v50 = vadd.f32 %v1581_v49, %v1558_v45 }
 0x764   : > { %v1606_v55 = vadd.f32 %v1605_v53, %v1582_v50 }
 0x767   : > { %v1629_v57 = vpop.f32.mrf.mxu2 }
 0x768   : > { %v1630_v59 = vadd.f32 %v1629_v57, %v1606_v55 }
 0x76a   : > { %v1652_v62 = vadd.f32 %v1651_v60, %v1630_v59 }
 0x76c   : > { %v1656_v0 = vsel %vm367_vm1, %v1652_v62, 0  ;;  %v2135_v62 = vld [vmem:[#allocation2 + $0x40] sm:$0xff] }
 0x76d   : > { %v1675_v1 = vand.u32 4294901760, %v1656_v0 }
 0x76f   : > { %v1676_v4 = vsub.f32 %v1656_v0, %v1675_v1  ;;  %1706 = vmatmul.f32.vlgmr.msrb.gmra.mxu1 %v1675_v1 }
 0x770   : > { %1905 = vmatpush.xpose.msrb.mxu1 %v3210_v23 }
 0x771   : > { %1730 = vmatmul.f32.vlgmr.msra.gmra.mxu2 %v1676_v4  ;;  %v1677_v5 = vand.u32 4294901760, %v1676_v4 }
 0x772   : > { %1931 = vmatpush.xpose.msra.mxu2 %v1856_v31 }
 0x773   : > { %1754 = vmatmul.f32.vlgmr.msra.gmra.mxu3 %v1677_v5  ;;  %v1678_v9 = vsub.f32 %v1676_v4, %v1677_v5 }
 0x774   : > { %1953 = vmatpush.xpose.msra.mxu3 %v3210_v23 }
 0x775   : > { %v1679_v10 = vand.u32 4294901760, %v1678_v9 }
 0x777   : > { %1680 = vmatmul.f32.vlgmr.msrb.gmra.mxu0 %v1679_v10  ;;  %1800 = vmatmul.f32.vlgmr.msra.gmra.mxu1 %v1675_v1 }
 0x778   : > { %1882 = vmatpush.xpose.msrb.mxu0 %v3213_v27  ;;  %2035 = vmatpush.msra.mxu1 %v2034_v11 }
 0x779   : > { %1835 = vmatmul.f32.vlgmr.msrb.gmra.mxu2 %v1834_v12 }
 0x77a   : > { %2058 = vmatpush.msrb.mxu2 %v2031_v61 }
 0x77b   : > { %1861 = vmatmul.f32.vlgmr.msrb.gmra.mxu3 %v1830_v56 }
 0x77c   : > { %2081 = vmatpush.msrb.mxu3 %v2004_v54 }
 0x77f   : > { %1778 = vmatmul.f32.vlgmr.msra.gmra.mxu0 %v1675_v1  ;;  %1909 = vmatmul.f32.vlgmr.msrb.gmra.mxu1 %v1832_v3 }
 0x780   : > { %2005 = vmatpush.msra.mxu0 %v2004_v54  ;;  %2129 = vmatpush.msrb.mxu1 %v2004_v54 }
 0x781   : > { %1933 = vmatmul.f32.vlgmr.msra.gmra.mxu2 %v1830_v56 }
 0x783   : > { %1955 = vmatmul.f32.vlgmr.msra.gmra.mxu3 %v1830_v56 }
 0x787   : > { %1885 = vmatmul.f32.vlgmr.msrb.gmra.mxu0 %v1831_v63  ;;  %v2154_v63 = vand.u32 4294901760, %v2135_v62 }
 0x788   : > { %2107 = vmatpush.msrb.mxu0 %v2032_v2 }
 0x789   : > { %v2181_v0 = vsub.f32 %v2135_v62, %v2154_v63  ;;  %2155 = vmatpush.msra.mxu2 %v2154_v63 }
 0x78b   : > { %v2182_v1 = vand.u32 4294901760, %v2181_v0 }
 0x78d   : > { %v2183_v2 = vsub.f32 %v2181_v0, %v2182_v1 }
 0x78f   : > { %v2184_v3 = vand.u32 4294901760, %v2183_v2 }
 0x791   : > { %2185 = vmatpush.msra.mxu3 %v2184_v3 }
 0x7ec   : > { %v1707_v14 = vpop.f32.mrf.mxu1 }
 0x7f4   : > { %v1681_v6 = vpop.f32.mrf.mxu0  ;;  %v1731_v15 = vpop.f32.mrf.mxu2 }
 0x7f5   : > { %v1708_v16 = vadd.f32 %v1707_v14, %v1681_v6  ;;  %v1801_v20 = vpop.f32.mrf.mxu1 }
 0x7f6   : > { %v1755_v17 = vpop.f32.mrf.mxu3 }
 0x7f7   : > { %v1732_v18 = vadd.f32 %v1731_v15, %v1708_v16 }
 0x7f9   : > { %v1756_v19 = vadd.f32 %v1755_v17, %v1732_v18 }
 0x7fc   : > { %v1779_v21 = vpop.f32.mrf.mxu0  ;;  %v1836_v23 = vpop.f32.mrf.mxu2 }
 0x7fd   : > { %v1780_v22 = vadd.f32 %v1779_v21, %v1756_v19  ;;  %v1910_v29 = vpop.f32.mrf.mxu1 }
 0x7fe   : > { %v1862_v24 = vpop.f32.mrf.mxu3 }
 0x7ff   : > { %v1802_v47 = vadd.f32 %v1801_v20, %v1780_v22  ;;  %v1863_v26 = vadd.f32 %v1862_v24, %v1836_v23 }
 0x801   : > { %v3226_v25 = vadd.f32 %v1802_v47, %v3200_v58 }
 0x804   : > { %v1886_v27 = vpop.f32.mrf.mxu0  ;;  %v1934_v31 = vpop.f32.mrf.mxu2 }
 0x805   : > { %v1887_v28 = vadd.f32 %v1886_v27, %v1863_v26 }
 0x806   : > { %v1956_v33 = vpop.f32.mrf.mxu3 }
 0x807   : > { %v1911_v30 = vadd.f32 %v1910_v29, %v1887_v28 }
 0x809   : > { %v1935_v32 = vadd.f32 %v1934_v31, %v1911_v30 }
 0x80b   : > { %v1957_v34 = vadd.f32 %v1956_v33, %v1935_v32  ;;  %v2931_v33 = vld [vmem:[#allocation2 + $0x48] ss:$0 sm:$0xff] }
 0x80d   : > { %v1959_v35 = vsel %vm367_vm1, %v1957_v34, -inf }
 0x80e   : > { %1960 = vmax.xlane.f32.xlu2 %v1959_v35 }
 0x881   : > { %v1961_v36 = vpop.xlane.xlu2 %1960 }
 0x882   : > { %v1962_v37 = vsub.f32 %v1957_v34, %v1961_v36  ;;  %v2960_v36 = vld [vmem:[%s3152_s4] sm:$0xff]  ;;  %s2781_s4 = sshll.u32 %s151_s3, 4  ;;  %s2782_s4 = int_to_ptr.vmem [resolvable:$true] %s2781_s4 }
 0x884   : > { %v1963_v38 = vmul.f32 1.442695, %v1962_v37 }
 0x886   : > { %2950 = vpow2.f32 %v1963_v38 }
 0x88c   : > { %v2951_v39 = vpop.eup %2950 }
 0x88d   : > { %v1965_v58 = vsel %vm367_vm1, %v2951_v39, 0.0 }
 0x88e   : > { %1966 = vadd.xlane.f32.xlu1 %v1965_v58 }
 0x8a7   : > { %2339 = vrot.lane.b32.xlu1 %v3206_v13, %s3062_s5 }
 0x8af   : > { %2335 = vrot.lane.b32.xlu1 %v3191_v48, %s3062_s5 }
 0x8b7   : > { %2540 = vrot.lane.b32.xlu1 %v3187_v41, %s3069_s21 }
 0x901   : > { %v1967_v40 = vpop.xlane.xlu1 %1966 }
 0x902   : > { %2952 = vrcp.f32 %v1967_v40  ;;  %v1979_v45 = vand.u32 2147483648, %v1967_v40  ;;  %v1977_v49 = vand.u32 2147483647, %v1967_v40  ;;  %vm1973_vm15 = vweird.f32 %v1967_v40 }
 0x904   : > { %v1980_v51 = vor.u32 1.1754944e-38, %v1979_v45  ;;  %vm1978_vm2 = vcmp.eq.f32.partialorder %v1977_v49, 8.507059e+37 }
 0x908   : > { %v2953_v42 = vpop.eup %2952 }
 0x909   : > { %v1969_v43 = vmul.f32 %v2953_v42, %v1967_v40  ;;  %vm1974_vm14 = vweird.f32 %v2953_v42 }
 0x90a   : > { %vm1975_vm0 = vmor %vm1973_vm15, %vm1974_vm14 }
 0x90b   : > { %v1970_v44 = vsub.f32 1.0, %v1969_v43 }
 0x90d   : > { %v1971_v46 = vmul.f32 %v2953_v42, %v1970_v44 }
 0x90f   : > { %v1972_v50 = vadd.f32 %v2953_v42, %v1971_v46 }
 0x911   : > { %v1976_v52 = vsel %vm1975_vm0, %v2953_v42, %v1972_v50 }
 0x912   : > { %v1981_v53 = vsel %vm1978_vm2, %v1980_v51, %v1976_v52 }
 0x913   : > { %v1982_v54 = vmul.f32 %v2951_v39, %v1981_v53  ;;  %v3073_v39 = vmov 32.0  }
 0x914   : > { %2954 = vrcp.f32 %v3073_v39 }
 0x915   : > { %v1987_v55 = vsel %vm367_vm1, %v1982_v54, 0 }
 0x916   : > { %v2006_v56 = vand.u32 4294901760, %v1987_v55 }
 0x918   : > { %2037 = vmatmul.f32.vlgmr.msra.gmra.mxu1 %v2006_v56  ;;  %v2007_v57 = vsub.f32 %v1987_v55, %v2006_v56 }
 0x919   : > { %2231 = vmatpush.msra.mxu1 %v2154_v63  ;;  %v2340_v51 = vpop.permute.xlu1 %2339 }
 0x91a   : > { %2061 = vmatmul.f32.vlgmr.msrb.gmra.mxu2 %v2007_v57  ;;  %v2008_v59 = vand.u32 4294901760, %v2007_v57  ;;  %v2364_v54 = vand.u32 4294901760, %v2340_v51 }
 0x91b   : > { %2257 = vmatpush.msrb.mxu2 %v2182_v1 }
 0x91c   : > { %2085 = vmatmul.f32.vlgmr.msrb.gmra.mxu3 %v2008_v59  ;;  %v2009_v60 = vsub.f32 %v2007_v57, %v2008_v59  ;;  %v2398_v57 = vsub.f32 %v2340_v51, %v2364_v54 }
 0x91d   : > { %2279 = vmatpush.msrb.mxu3 %v2154_v63 }
 0x91e   : > { %v2010_v61 = vand.u32 4294901760, %v2009_v60 }
 0x920   : > { %2011 = vmatmul.f32.vlgmr.msra.gmra.mxu0 %v2010_v61  ;;  %2131 = vmatmul.f32.vlgmr.msrb.gmra.mxu1 %v2006_v56 }
 0x921   : > { %2208 = vmatpush.msra.mxu0 %v2181_v0  ;;  %v2336_v60 = vpop.permute.xlu1 %2335 }
 0x922   : > { %v2368_v0 = vand.u32 4294901760, %v2336_v60 }
 0x924   : > { %v2410_v2 = vsub.f32 %v2336_v60, %v2368_v0 }
 0x928   : > { %2109 = vmatmul.f32.vlgmr.msrb.gmra.mxu0 %v2006_v56 }
 0x995   : > { %v2038_v4 = vpop.f32.mrf.mxu1 }
 0x99d   : > { %v2012_v5 = vpop.f32.mrf.mxu0  ;;  %v2062_v8 = vpop.f32.mrf.mxu2 }
 0x99e   : > { %v2039_v7 = vadd.f32 %v2038_v4, %v2012_v5  ;;  %v2132_v6 = vpop.f32.mrf.mxu1  ;;  %v2411_v4 = vand.u32 4294901760, %v2410_v2 }
 0x99f   : > { %v2086_v10 = vpop.f32.mrf.mxu3 }
 0x9a0   : > { %v2063_v9 = vadd.f32 %v2062_v8, %v2039_v7 }
 0x9a2   : > { %v2087_v11 = vadd.f32 %v2086_v10, %v2063_v9  ;;  %v2412_v9 = vsub.f32 %v2410_v2, %v2411_v4 }
 0x9a4   : > { %v2413_v10 = vand.u32 4294901760, %v2412_v9 }
 0x9a5   : > { %v2110_v12 = vpop.f32.mrf.mxu0 }
 0x9a6   : > { %v2111_v14 = vadd.f32 %v2110_v12, %v2087_v11 }
 0x9a8   : > { %v2133_v15 = vadd.f32 %v2132_v6, %v2111_v14 }
 0x9aa   : > { %v2137_v16 = vsel %vm367_vm1, %v2133_v15, 0  ;;  %vm2292_vm1 = vcmask 261120  }
 0x9ab   : > { %v2156_v17 = vand.u32 4294901760, %v2137_v16 }
 0x9ad   : > { %v2157_v18 = vsub.f32 %v2137_v16, %v2156_v17  ;;  %2187 = vmatmul.f32.vlgmr.msra.gmra.mxu3 %v2156_v17 }
 0x9af   : > { %2211 = vmatmul.f32.vlgmr.msra.gmra.mxu0 %v2157_v18  ;;  %v2158_v19 = vand.u32 4294901760, %v2157_v18 }
 0x9b1   : > { %2235 = vmatmul.f32.vlgmr.msra.gmra.mxu1 %v2158_v19  ;;  %v2159_v20 = vsub.f32 %v2157_v18, %v2158_v19 }
 0x9b3   : > { %v2160_v21 = vand.u32 4294901760, %v2159_v20  ;;  %v2932_v20 = vld [vmem:[#allocation2 + $0x49] ss:$0 sm:$0xff] }
 0x9b5   : > { %2161 = vmatmul.f32.vlgmr.msra.gmra.mxu2 %v2160_v21  ;;  %2281 = vmatmul.f32.vlgmr.msrb.gmra.mxu3 %v2156_v17 }
 0x9bd   : > { %2259 = vmatmul.f32.vlgmr.msrb.gmra.mxu2 %v2156_v17 }
 0xa2c   : > { %v2212_v24 = vpop.f32.mrf.mxu0 }
 0xa2e   : > { %v2236_v27 = vpop.f32.mrf.mxu1 }
 0xa30   : > { %v2188_v22 = vpop.f32.mrf.mxu3 }
 0xa38   : > { %v2162_v23 = vpop.f32.mrf.mxu2  ;;  %v2282_v31 = vpop.f32.mrf.mxu3 }
 0xa39   : > { %v2189_v47 = vadd.f32 %v2188_v22, %v2162_v23  ;;  %v2933_v23 = vld [vmem:[#allocation2 + $0x4a] ss:$0 sm:$0xff] }
 0xa3b   : > { %v2213_v26 = vadd.f32 %v2212_v24, %v2189_v47 }
 0xa3d   : > { %v2237_v28 = vadd.f32 %v2236_v27, %v2213_v26 }
 0xa40   : > { %v2260_v29 = vpop.f32.mrf.mxu2 }
 0xa41   : > { %v2261_v30 = vadd.f32 %v2260_v29, %v2237_v28 }
 0xa43   : > { %v2283_v32 = vadd.f32 %v2282_v31, %v2261_v30 }
 0xa45   : > { %v2285_v34 = vadd.f32 %v2283_v32, %v3226_v25  ;;  %v2955_v25 = vpop.eup %2954 }
 0xa46   : > { %v2297_v58 = vmul.f32 32.0, %v2955_v25  ;;  %vm2301_vm3 = vweird.f32 %v2955_v25 }
 0xa47   : > { %v2288_v35 = vadd.f32 %v2931_v33, %v2285_v34 }
 0xa48   : > { %v2298_v40 = vsub.f32 1.0, %v2297_v58 }
 0xa49   : > { %v2289_v37 = vadd.f32 %v2960_v36, %v2288_v35 }
 0xa4a   : > { %v2299_v42 = vmul.f32 %v2955_v25, %v2298_v40 }
 0xa4b   : > { %v2293_v38 = vsel %vm2292_vm1, %v2289_v37, 0.0 }
 0xa4c   : > { %2294 = vadd.xlane.f32.xlu2 %v2293_v38  ;;  %v2300_v43 = vadd.f32 %v2955_v25, %v2299_v42  ;;  %v2541_v38 = vpop.permute.xlu1 %2540 }
 0xa4d   : > { %v2569_v58 = vand.u32 4294901760, %v2541_v38 }
 0xa4e   : > { %v3247_v44 = vsel %vm2301_vm3, %v2955_v25, %v2300_v43 }
 0xa64   : > { %2341 = vrot.lane.b32.xlu2 %v2135_v62, %s3062_s5 }
 0xa6c   : > { %2337 = vrot.lane.b32.xlu2 %v3187_v41, %s3062_s5  ;;  %s2783_s5 = sshll.u32 %s2779_s30, 4  ;;  %s2784_s5 = int_to_ptr.hbm [resolvable:$true] %s2783_s5 }
 0xa6d   : > { %s3005_s6 = sshra.s32 %s2784_s5, 4  ;;  %s3006_s6 = int_to_ptr.hbm [resolvable:$true] %s3005_s6 }
 0xa6e   : > { %s3007_s7 = scalar_lea.hbm %s3006_s6, 8  ;;  %p3012_p3 = scmp.lt.s32.totalorder %s3006_s6, %s3304_s2 }
 0xa6f   : > { %p3008_p0 = scmp.ne.s32.totalorder %s3006_s6, %s3007_s7  ;;  %p3013_p4 = scmp.lt.s32.totalorder %s3011_s16, %s3007_s7 }
 0xa71   : > { %p3009_p1 = pnand %p3008_p0, %p3127_p5  ;;  %p3014_p7 = por %p3013_p4, %p3012_p3 }
 0xa73   : > { %p3010_p2 = pneg %p3009_p1 }
 0xa74   : > { %2544 = vrot.lane.b32.xlu2 %v2135_v62, %s3069_s21  ;;  %v2399_v62 = vand.u32 4294901760, %v2398_v57 }
 0xa75   : > { %p3015_p8 = pnand %p3014_p7, %p3010_p2 }
 0xa76   : > { %v2400_v3 = vsub.f32 %v2398_v57, %v2399_v62 }
 0xa78   : > { %v2401_v5 = vand.u32 4294901760, %v2400_v3 }
 0xa7c   : > { %2538 = vrot.lane.b32.xlu2 %v3191_v48, %s3069_s21 }
 0xabf   : > { %v2295_v45 = vpop.xlane.xlu2 %2294 }
 0xac0   : > { %v2303_v46 = vmul.f32 %v3247_v44, %v2295_v45  ;;  %v2607_v45 = vsub.f32 %v2541_v38, %v2569_v58 }
 0xac2   : > { %v3250_v49 = vsub.f32 %v2289_v37, %v2303_v46 }
 0xac4   : > { %v2305_v41 = vmul.f32 %v3250_v49, %v3250_v49 }
 0xac6   : > { %v2306_v48 = vsel %vm2292_vm1, %v2305_v41, 0.0 }
 0xac7   : > { %2307 = vadd.xlane.f32.xlu0 %v2306_v48  ;;  %v2342_v50 = vpop.permute.xlu2 %2341 }
 0xac8   : > { %v2362_v52 = vand.u32 4294901760, %v2342_v50 }
 0xaca   : > { %v2392_v53 = vsub.f32 %v2342_v50, %v2362_v52  ;;  %2363 = vmatpush.msrb.mxu0 %v2362_v52  ;;  %2463 = vmatpush.msra.mxu3 %v2362_v52 }
 0xacc   : > { %v2393_v56 = vand.u32 4294901760, %v2392_v53  ;;  %2365 = vmatpush.msrb.mxu0 %v2364_v54  ;;  %2434 = vmatpush.msra.mxu2 %v2392_v53 }
 0xacd   : > { %2465 = vmatpush.msra.mxu3 %v2364_v54 }
 0xace   : > { %v2394_v61 = vsub.f32 %v2392_v53, %v2393_v56  ;;  %2437 = vmatpush.msra.mxu2 %v2398_v57 }
 0xacf   : > { %v2338_v55 = vpop.permute.xlu2 %2337 }
 0xad0   : > { %v2366_v59 = vand.u32 4294901760, %v2338_v55 }
 0xad2   : > { %v2404_v63 = vsub.f32 %v2338_v55, %v2366_v59  ;;  %2367 = vmatpush.msrb.mxu0 %v2366_v59  ;;  %2467 = vmatpush.msra.mxu3 %v2366_v59 }
 0xad4   : > { %v2405_v1 = vand.u32 4294901760, %v2404_v63  ;;  %2369 = vmatpush.msrb.mxu0 %v2368_v0  ;;  %2440 = vmatpush.msra.mxu2 %v2404_v63 }
 0xad5   : > { %2469 = vmatpush.msra.mxu3 %v2368_v0 }
 0xad6   : > { %2492 = vmatpush.msra.mxu0 %v2393_v56  ;;  %v2406_v7 = vsub.f32 %v2404_v63, %v2405_v1  ;;  %2443 = vmatpush.msra.mxu2 %v2410_v2  ;;  %v2934_v56 = vld [vmem:[#allocation2 + $0x4b] ss:$0 sm:$0xff] }
 0xad7   : > { %v2545_v32 = vpop.permute.xlu2 %2544 }
 0xad8   : > { %2496 = vmatpush.msra.mxu0 %v2399_v62  ;;  %v2407_v8 = vand.u32 4294901760, %v2406_v7  ;;  %v2565_v33 = vand.u32 4294901760, %v2545_v32 }
 0xada   : > { %2500 = vmatpush.msra.mxu0 %v2405_v1  ;;  %v2595_v34 = vsub.f32 %v2545_v32, %v2565_v33  ;;  %2566 = vmatpush.msrb.mxu2 %v2565_v33 }
 0xadb   : > { %2542 = vrot.lane.b32.xlu0 %v3206_v13, %s3069_s21  ;;  %v2395_v13 = vand.u32 4294901760, %v2394_v61 }
 0xadc   : > { %2504 = vmatpush.msra.mxu0 %v2411_v4  ;;  %v2596_v36 = vand.u32 4294901760, %v2595_v34 }
 0xadd   : > { %2396 = vmatpush.msrb.mxu1 %v2395_v13 }
 0xade   : > { %v2597_v39 = vsub.f32 %v2595_v34, %v2596_v36 }
 0xadf   : > { %2402 = vmatpush.msrb.mxu1 %v2401_v5  ;;  %v2539_v40 = vpop.permute.xlu2 %2538 }
 0xae0   : > { %v2598_v42 = vand.u32 4294901760, %v2597_v39  ;;  %v2571_v46 = vand.u32 4294901760, %v2539_v40 }
 0xae1   : > { %2408 = vmatpush.msrb.mxu1 %v2407_v8 }
 0xae2   : > { %v2613_v41 = vsub.f32 %v2539_v40, %v2571_v46  ;;  %2599 = vmatpush.msrb.mxu3 %v2598_v42  ;;  %v2936_v40 = vld [vmem:[#allocation2 + $0x4d] ss:$0 sm:$0xff] }
 0xae3   : > { %2414 = vmatpush.msrb.mxu1 %v2413_v10 }
 0xae4   : > { %v2614_v50 = vand.u32 4294901760, %v2613_v41 }
 0xae5   : > { %2523 = vmatpush.msra.mxu1 %v2362_v52 }
 0xae7   : > { %2525 = vmatpush.msra.mxu1 %v2364_v54  ;;  %v2615_v54 = vsub.f32 %v2613_v41, %v2614_v50 }
 0xae9   : > { %2527 = vmatpush.msra.mxu1 %v2366_v59  ;;  %v2616_v55 = vand.u32 4294901760, %v2615_v54 }
 0xaeb   : > { %2529 = vmatpush.msra.mxu1 %v2368_v0 }
 0xb3a   : > { %v2308_v11 = vpop.xlane.xlu0 %2307 }
 0xb3b   : > { %v2309_v12 = vmul.f32 %v2308_v11, %v3247_v44 }
 0xb3d   : > { %v2310_v14 = vadd.f32 1e-05, %v2309_v12 }
 0xb3f   : > { %2956 = vrsqrt.f32 %v2310_v14  ;;  %vm2317_vm5 = vweird.f32 %v2310_v14 }
 0xb45   : > { %v2957_v6 = vpop.eup %2956 }
 0xb46   : > { %v2312_v15 = vmul.f32 %v2957_v6, %v2310_v14  ;;  %vm2318_vm4 = vweird.f32 %v2957_v6  ;;  %v2935_v14 = vld [vmem:[#allocation2 + $0x4c] ss:$0 sm:$0xff] }
 0xb47   : > { %vm2319_vm6 = vmor %vm2317_vm5, %vm2318_vm4 }
 0xb48   : > { %v2313_v16 = vmul.f32 %v2957_v6, %v2312_v15 }
 0xb4a   : > { %v2314_v17 = vmul.f32 0.5, %v2313_v16 }
 0xb4c   : > { %v2315_v18 = vsub.f32 1.5, %v2314_v17 }
 0xb4d   : > { %v2543_v35 = vpop.permute.xlu0 %2542 }
 0xb4e   : > { %v2316_v19 = vmul.f32 %v2957_v6, %v2315_v18  ;;  %v2567_v37 = vand.u32 4294901760, %v2543_v35 }
 0xb50   : > { %v2320_v21 = vsel %vm2319_vm6, %v2957_v6, %v2316_v19  ;;  %v2601_v25 = vsub.f32 %v2543_v35, %v2567_v37  ;;  %2568 = vmatpush.msrb.mxu2 %v2567_v37 }
 0xb51   : > { %v2321_v22 = vmul.f32 %v2320_v21, %v3250_v49  ;;  %v2608_v49 = vand.u32 4294901760, %v2607_v45 }
 0xb52   : > { %v2602_v43 = vand.u32 4294901760, %v2601_v25  ;;  %2570 = vmatpush.msrb.mxu2 %v2569_v58 }
 0xb53   : > { %v2323_v47 = vmul.f32 %v2932_v20, %v2321_v22  ;;  %v2609_v52 = vsub.f32 %v2607_v45, %v2608_v49 }
 0xb54   : > { %v2603_v48 = vsub.f32 %v2601_v25, %v2602_v43  ;;  %2572 = vmatpush.msrb.mxu2 %v2571_v46 }
 0xb55   : > { %v3259_v24 = vadd.f32 %v2933_v23, %v2323_v47  ;;  %v2610_v53 = vand.u32 4294901760, %v2609_v52 }
 0xb56   : > { %v2604_v51 = vand.u32 4294901760, %v2603_v48 }
 0xb57   : > { %v2348_v26 = vsel %vm2292_vm1, %v3259_v24, 0 }
 0xb58   : > { %v2370_v27 = vand.u32 4294901760, %v2348_v26  ;;  %2605 = vmatpush.msrb.mxu3 %v2604_v51 }
 0xb5a   : > { %2416 = vmatmul.f32.vlgmr.msrb.gmra.mxu1 %v2370_v27  ;;  %v2371_v28 = vsub.f32 %v2348_v26, %v2370_v27  ;;  %2611 = vmatpush.msrb.mxu3 %v2610_v53 }
 0xb5b   : > { %2666 = vmatpush.msrb.mxu1 %v2565_v33 }
 0xb5c   : > { %2446 = vmatmul.f32.vlgmr.msra.gmra.mxu2 %v2371_v28  ;;  %v2372_v29 = vand.u32 4294901760, %v2371_v28  ;;  %2617 = vmatpush.msrb.mxu3 %v2616_v55 }
 0xb5d   : > { %2668 = vmatpush.msrb.mxu1 %v2567_v37  ;;  %2695 = vmatpush.msra.mxu2 %v2596_v36 }
 0xb5e   : > { %2473 = vmatmul.f32.vlgmr.msra.gmra.mxu3 %v2372_v29  ;;  %v2373_v30 = vsub.f32 %v2371_v28, %v2372_v29 }
 0xb5f   : > { %2670 = vmatpush.msrb.mxu1 %v2569_v58  ;;  %2699 = vmatpush.msra.mxu2 %v2602_v43  ;;  %v2937_v43 = vld [vmem:[#allocation2 + $0x4e] ss:$0 sm:$0xff] }
 0xb60   : > { %v2374_v31 = vand.u32 4294901760, %v2373_v30  ;;  %2726 = vmatpush.msra.mxu3 %v2565_v33 }
 0xb61   : > { %2672 = vmatpush.msrb.mxu1 %v2571_v46  ;;  %2703 = vmatpush.msra.mxu2 %v2608_v49 }
 0xb62   : > { %2375 = vmatmul.f32.vlgmr.msrb.gmra.mxu0 %v2374_v31  ;;  %2531 = vmatmul.f32.vlgmr.msra.gmra.mxu1 %v2370_v27 }
 0xb63   : > { %2637 = vmatpush.msrb.mxu0 %v2595_v34  ;;  %2707 = vmatpush.msra.mxu2 %v2614_v50 }
 0xb64   : > { %2728 = vmatpush.msra.mxu3 %v2567_v37 }
 0xb65   : > { %2640 = vmatpush.msrb.mxu0 %v2601_v25 }
 0xb66   : > { %2730 = vmatpush.msra.mxu3 %v2569_v58 }
 0xb67   : > { %2643 = vmatpush.msrb.mxu0 %v2607_v45 }
 0xb68   : > { %2732 = vmatpush.msra.mxu3 %v2571_v46 }
 0xb69   : > { %2646 = vmatpush.msrb.mxu0 %v2613_v41 }
 0xb6a   : > { %2506 = vmatmul.f32.vlgmr.msra.gmra.mxu0 %v2370_v27 }
 0xbd7   : > { %v2417_v57 = vpop.f32.mrf.mxu1 }
 0xbdf   : > { %v2376_v59 = vpop.f32.mrf.mxu0  ;;  %v2447_v62 = vpop.f32.mrf.mxu2 }
 0xbe0   : > { %v2377_v60 = vadd.f32 %v2934_v56, %v2376_v59  ;;  %v2532_v3 = vpop.f32.mrf.mxu1 }
 0xbe1   : > { %v2474_v0 = vpop.f32.mrf.mxu3 }
 0xbe2   : > { %v2418_v61 = vadd.f32 %v2417_v57, %v2377_v60 }
 0xbe4   : > { %v2448_v63 = vadd.f32 %v2447_v62, %v2418_v61 }
 0xbe6   : > { %v2475_v13 = vadd.f32 %v2474_v0, %v2448_v63 }
 0xbe7   : > { %v2507_v1 = vpop.f32.mrf.mxu0 }
 0xbe8   : > { %v2508_v2 = vadd.f32 %v2507_v1, %v2475_v13 }
 0xbea   : > { %v2533_v4 = vadd.f32 %v2532_v3, %v2508_v2 }
 0xbec   : > { %v2535_v5 = vmax.f32 %v2533_v4, 0.0 }
 0xbee   : > { %v2551_v7 = vsel %vm2292_vm1, %v2535_v5, 0 }
 0xbef   : > { %v2573_v8 = vand.u32 4294901760, %v2551_v7 }
 0xbf1   : > { %v2574_v9 = vsub.f32 %v2551_v7, %v2573_v8  ;;  %2619 = vmatmul.f32.vlgmr.msrb.gmra.mxu3 %v2573_v8 }
 0xbf3   : > { %2649 = vmatmul.f32.vlgmr.msrb.gmra.mxu0 %v2574_v9  ;;  %v2575_v10 = vand.u32 4294901760, %v2574_v9 }
 0xbf5   : > { %2676 = vmatmul.f32.vlgmr.msrb.gmra.mxu1 %v2575_v10  ;;  %v2576_v11 = vsub.f32 %v2574_v9, %v2575_v10 }
 0xbf7   : > { %v2577_v12 = vand.u32 4294901760, %v2576_v11 }
 0xbf9   : > { %2578 = vmatmul.f32.vlgmr.msrb.gmra.mxu2 %v2577_v12  ;;  %2734 = vmatmul.f32.vlgmr.msra.gmra.mxu3 %v2573_v8 }
 0xc01   : > { %2709 = vmatmul.f32.vlgmr.msra.gmra.mxu2 %v2573_v8 }
 0xc70   : > { %v2650_v18 = vpop.f32.mrf.mxu0 }
 0xc72   : > { %v2677_v20 = vpop.f32.mrf.mxu1 }
 0xc74   : > { %v2620_v6 = vpop.f32.mrf.mxu3 }
 0xc7c   : > { %v2579_v15 = vpop.f32.mrf.mxu2  ;;  %v2735_v47 = vpop.f32.mrf.mxu3 }
 0xc7d   : > { %v2580_v16 = vadd.f32 %v2935_v14, %v2579_v15 }
 0xc7f   : > { %v2621_v17 = vadd.f32 %v2620_v6, %v2580_v16 }
 0xc81   : > { %v2651_v19 = vadd.f32 %v2650_v18, %v2621_v17 }
 0xc83   : > { %v2678_v21 = vadd.f32 %v2677_v20, %v2651_v19 }
 0xc84   : > { %v2710_v22 = vpop.f32.mrf.mxu2 }
 0xc85   : > { %v2711_v23 = vadd.f32 %v2710_v22, %v2678_v21 }
 0xc87   : > { %v2736_v26 = vadd.f32 %v2735_v47, %v2711_v23 }
 0xc89   : > { %v2738_v27 = vadd.f32 %v2736_v26, %v3259_v24 }
 0xc8b   : > { %v2741_v28 = vsel %vm2292_vm1, %v2738_v27, 0.0 }
 0xc8c   : > { %2742 = vadd.xlane.f32.xlu1 %v2741_v28 }
 0xcff   : > { %v2743_v29 = vpop.xlane.xlu1 %2742 }
 0xd00   : > { %v2744_v30 = vmul.f32 %v2743_v29, %v3247_v44 }
 0xd02   : > { %v2745_v31 = vsub.f32 %v2738_v27, %v2744_v30 }
 0xd04   : > { %v2746_v32 = vmul.f32 %v2745_v31, %v2745_v31 }
 0xd06   : > { %v2747_v33 = vsel %vm2292_vm1, %v2746_v32, 0.0 }
 0xd07   : > { %2748 = vadd.xlane.f32.xlu2 %v2747_v33 }
 0xd7a   : > { %v2749_v34 = vpop.xlane.xlu2 %2748 }
 0xd7b   : > { %v2750_v35 = vmul.f32 %v2749_v34, %v3247_v44 }
 0xd7d   : > { %v2751_v36 = vadd.f32 1e-05, %v2750_v35 }
 0xd7f   : > { %2958 = vrsqrt.f32 %v2751_v36  ;;  %vm2758_vm8 = vweird.f32 %v2751_v36 }
 0xd85   : > { %v2959_v37 = vpop.eup %2958 }
 0xd86   : > { %v2753_v24 = vmul.f32 %v2959_v37, %v2751_v36  ;;  %vm2759_vm7 = vweird.f32 %v2959_v37 }
 0xd87   : > { %vm2760_vm9 = vmor %vm2758_vm8, %vm2759_vm7 }
 0xd88   : > { %v2754_v38 = vmul.f32 %v2959_v37, %v2753_v24 }
 0xd8a   : > { %v2755_v39 = vmul.f32 0.5, %v2754_v38 }
 0xd8c   : > { %v2756_v25 = vsub.f32 1.5, %v2755_v39 }
 0xd8e   : > { %v2757_v58 = vmul.f32 %v2959_v37, %v2756_v25 }
 0xd90   : > { %v2761_v44 = vsel %vm2760_vm9, %v2959_v37, %v2757_v58 }
 0xd91   : > { %v2762_v42 = vmul.f32 %v2761_v44, %v2745_v31 }
 0xd93   : > { %v2764_v45 = vmul.f32 %v2936_v40, %v2762_v42 }
 0xd95   : > { %v2766_v46 = vadd.f32 %v2937_v43, %v2764_v45 }
 0xd97   : > { %2767 = vst.msk [vmem:[%s151_s3] sm:$0xff] %vm2292_vm1, %v2766_v46 }
 0xd98   : > { %3018 = shalt.err (!%p3015_p8)
}
 0xd99   : > { %2871 = dma.vmem_to_hbm [thread:$0]  (%p3127_p5), %s2782_s4, 128, %s2784_s5, %s2769_s13  }
 0xd9a PF: > { %p2883_p9 = scmp.ge.s32.totalorder %s3057_s12, 2  ;;  %s2795_s22 = sand.u32 1, %s3045_s9  }
 0xd9b   : > { %s2796_s23 = scalar_lea.sflag [#allocation4], %s2795_s22 }
 0xd9c   : > { %p2878_p10 = pnand %p2883_p9, %p3131_p6 }
 0xd9e   : > { %p2879_p11 = pneg %p2878_p10 }
 0xda0   : > { %3040 = dma.done.wait (%p2879_p11), %s2796_s23, 128  }
 0xda1   : > { %3042 = vsyncadd (%p2879_p11), %s2796_s23, 4294967168  ;;  %p13_p12 = scmp.ge.s32.totalorder %s3114_s15, 4   ;;  %s3307_s9 = smov %s3049_s10 }
 0xda2   : > { %s3308_s10 = smov %s3053_s11  ;;  %s3309_s11 = smov %s3125_s18 }
 0xda3   : > { %s3310_s12 = smov %s3114_s15  ;;  %15 = sbr.rel (!%p13_p12) target bundleno = 4 (0x4), region = 68 }
 0xda8   :  { %2802 = vsyncpa [#allocation3], 1 }
 0xda9   :  { %2804 = vsyncpa [#allocation3 + $0x1], 1 }
 0xdaa   :  { %2805 = vsyncpa [#allocation4], 1 }
 0xdab   :  { %2807 = vsyncpa [#allocation4 + $0x1], 1 }

</bundles_post_ra>
